<compile_context>
chip_gen: v7x
topology: tpu7x:2x2x1
jax: 0.10.0
libtpu: 0.0.40
codegen_flags: <defaults>
</compile_context>

<pallas_src>
import math

import jax
import jax.numpy as jnp
from jax.experimental import pallas as pl
from jax.experimental.pallas import tpu as pltpu

HIDDEN = 24
NUM_HEADS = 2
NUM_LAYERS = 2
EMBED_DIM = 32
HEAD_DIM = HIDDEN // NUM_HEADS
LN_EPS = 1e-5
FC1_OUT = 6

MAX_TILE_S = 1024                    # per-tile activations are < 1 MiB even here
VMEM_LIMIT_BYTES = 16 * 1024 * 1024  # ~5x actual footprint; well under v7x 64 MiB


def _layer_norm(x, w, b):
    # features live on the sublane axis (axis 0); tokens on lanes (axis 1)
    mu = jnp.mean(x, axis=0, keepdims=True)
    xc = x - mu
    var = jnp.mean(xc * xc, axis=0, keepdims=True)
    inv = jax.lax.rsqrt(var + LN_EPS)
    return xc * inv * w + b


def _attend_head(q_bh, k_heads, v_heads, scale):
    """Softmax attention of one query column-slab against B key/value slabs.

    q_bh: (HEAD_DIM, TS); k_heads / v_heads: length-B lists of (HEAD_DIM, TS).
    The softmax axis is the (tiny) original batch axis B, so everything is a
    VPU broadcast-multiply + a 12-row sublane reduce -- no batched MXU matmuls.
    """
    B = len(k_heads)
    scores = [scale * jnp.sum(q_bh * k_c, axis=0, keepdims=True)
              for k_c in k_heads]                                   # B x (1, TS)
    if B == 2:
        # softmax over 2 keys == sigmoid of the score difference
        p0 = pl.reciprocal(1.0 + jnp.exp(scores[1] - scores[0]), approx=True)
        return v_heads[1] + p0 * (v_heads[0] - v_heads[1])
    m = scores[0]
    for s in scores[1:]:
        m = jnp.maximum(m, s)
    es = [jnp.exp(s - m) for s in scores]
    denom = es[0]
    for e in es[1:]:
        denom = denom + e
    inv = pl.reciprocal(denom, approx=True)
    out = (es[0] * inv) * v_heads[0]
    for c in range(1, B):
        out = out + (es[c] * inv) * v_heads[c]
    return out


def transformer_kernel(x_ref, pe_ref,
                       w_x_ref, w_pe_ref, b_in_ref,
                       wqkv_ref, bqkv_ref, wo_ref, bo_ref,
                       ln1_w_ref, ln1_b_ref, ln2_w_ref, ln2_b_ref,
                       ff1_w_ref, ff1_b_ref, ff2_w_ref, ff2_b_ref,
                       fc1_w_ref, fc1_b_ref, fc2_w_ref, fc2_b_ref,
                       out_ref):
    B, TS = x_ref.shape               # (batch, tile of S)
    H, HD = HIDDEN, HEAD_DIM
    f32 = jnp.float32
    scale = 1.0 / math.sqrt(HD)

    x = x_ref[...]                    # (B, TS)   fp32
    pe = pe_ref[...]                  # (E, TS)   fp32

    # ---- input embedding, tokens on lanes: tok = W_in @ [x; pe] + b ---------
    pe_proj = jnp.dot(w_pe_ref[...], pe, preferred_element_type=f32)   # (H, TS)
    base = pe_proj + b_in_ref[...]
    w_x = w_x_ref[...]                                                  # (H, 1)
    tok = jnp.concatenate(
        [base + w_x * x[b:b + 1, :] for b in range(B)], axis=1)        # (H, B*TS)

    for l in range(NUM_LAYERS):
        # ---- fused QKV for both heads: one (3H, H) @ (H, B*TS) matmul -------
        qkv = jnp.dot(wqkv_ref[l], tok, preferred_element_type=f32) + bqkv_ref[l]
        q, k, v = qkv[0:H], qkv[H:2 * H], qkv[2 * H:3 * H]

        # ---- self-attention over the original batch axis, per timestep ------
        attn_cols = []
        for b in range(B):
            heads = []
            for h in range(NUM_HEADS):
                rows = slice(h * HD, (h + 1) * HD)
                q_bh = q[rows, b * TS:(b + 1) * TS]
                k_h = [k[rows, c * TS:(c + 1) * TS] for c in range(B)]
                v_h = [v[rows, c * TS:(c + 1) * TS] for c in range(B)]
                heads.append(_attend_head(q_bh, k_h, v_h, scale))
            attn_cols.append(jnp.concatenate(heads, axis=0))            # (H, TS)
        attn_cat = jnp.concatenate(attn_cols, axis=1)                   # (H, B*TS)

        # fused head output projection (heads already concatenated on sublanes)
        attn = jnp.dot(wo_ref[l], attn_cat, preferred_element_type=f32) + bo_ref[l]
        tok = _layer_norm(tok + attn, ln1_w_ref[l], ln1_b_ref[l])

        # ---- feed-forward (relu), dim_feedforward == hidden_size ------------
        h1 = jnp.maximum(
            jnp.dot(ff1_w_ref[l], tok, preferred_element_type=f32) + ff1_b_ref[l],
            0.0)
        h2 = jnp.dot(ff2_w_ref[l], h1, preferred_element_type=f32) + ff2_b_ref[l]
        tok = _layer_norm(tok + h2, ln2_w_ref[l], ln2_b_ref[l])

    # ---- head: fc1 -> tanh -> fc2 (fc2 as VPU multiply + 6-row reduce) ------
    z = jnp.tanh(jnp.dot(fc1_w_ref[...], tok, preferred_element_type=f32)
                 + fc1_b_ref[...])                                      # (6, B*TS)
    y = jnp.sum(z * fc2_w_ref[...], axis=0, keepdims=True) + fc2_b_ref[...]  # (1, B*TS)

    # lane-dense (B, TS) store, no transpose needed
    for b in range(B):
        out_ref[b:b + 1, :] = y[:, b * TS:(b + 1) * TS]


def temporal_embedding(seq_length):
    position = (jnp.arange(seq_length) % 1400).astype(jnp.float32)[:, None]
    div_term = jnp.exp(jnp.arange(0, EMBED_DIM, 2).astype(jnp.float32)
                       * (-math.log(10000.0) / EMBED_DIM))
    ang = position * div_term                           # (S, EMBED_DIM/2)
    pe = jnp.zeros((seq_length, EMBED_DIM), jnp.float32)
    pe = pe.at[:, 0::2].set(jnp.sin(ang))
    pe = pe.at[:, 1::2].set(jnp.cos(ang))
    return pe


def _choose_tile(S):
    """Tile over timesteps.  Large tiles amortize per-grid-step overhead; for
    long sequences force an even number (>=2) of tiles so the 'parallel' grid
    axis shards across both TensorCores on v7x."""
    if S <= 256:
        return S, S                              # single tile; padding not worth it
    n = max(2, pl.cdiv(S, MAX_TILE_S))
    if n % 2:
        n += 1
    tile = pl.cdiv(pl.cdiv(S, n), 128) * 128     # lane-aligned tile size
    return tile, tile * n


def transformer_forward(x, params):
    B, S = x.shape
    x = x.astype(jnp.float32)                    # (B, S)
    pe = temporal_embedding(S).T                 # (E, S), tokens on lanes

    tile_s, s_pad = _choose_tile(S)
    if s_pad != S:
        x = jnp.pad(x, ((0, 0), (0, s_pad - S)))
        pe = jnp.pad(pe, ((0, 0), (0, s_pad - S)))
    grid = (s_pad // tile_s,)

    def full_spec(shape):
        nd = len(shape)
        return pl.BlockSpec(shape, lambda i, _nd=nd: (0,) * _nd)

    in_specs = ([pl.BlockSpec((B, tile_s), lambda i: (0, i)),
                 pl.BlockSpec((EMBED_DIM, tile_s), lambda i: (0, i))]
                + [full_spec(p.shape) for p in params])
    out_specs = pl.BlockSpec((B, tile_s), lambda i: (0, i))

    per_tok_flops = (2 * (1 + EMBED_DIM) * HIDDEN
                     + NUM_LAYERS * (2 * HIDDEN * 3 * HIDDEN   # fused QKV
                                     + 4 * B * HIDDEN          # scores + weighted sum
                                     + 2 * HIDDEN * HIDDEN     # out-proj
                                     + 4 * HIDDEN * HIDDEN)    # FFN
                     + 2 * HIDDEN * FC1_OUT + 2 * FC1_OUT)
    flops = int(s_pad) * int(B) * per_tok_flops
    transcendentals = int(s_pad) * int(B) * (
        NUM_LAYERS * (NUM_HEADS * max(B - 1, 1) + 2) + FC1_OUT)
    bytes_accessed = 4 * (2 * B * s_pad + EMBED_DIM * s_pad) + sum(
        int(p.size) * int(p.dtype.itemsize) for p in params)
    cost = pl.CostEstimate(flops=flops, transcendentals=transcendentals,
                           bytes_accessed=bytes_accessed)

    out = pl.pallas_call(
        transformer_kernel,
        out_shape=jax.ShapeDtypeStruct((B, s_pad), jnp.float32),
        grid=grid,
        in_specs=in_specs,
        out_specs=out_specs,
        compiler_params=pltpu.CompilerParams(
            dimension_semantics=("parallel",),       # 2-TC sharding on v7x
            vmem_limit_bytes=VMEM_LIMIT_BYTES),
        cost_estimate=cost,
    )(x, pe, *params)

    out = out[:, :S]              # drop S padding
    # matches `out[:, -1440:, :]` (fc1/tanh/fc2 commute with the slice)
    return out[:, -1440:]


def init_params(key):
    H, E, L = HIDDEN, EMBED_DIM, NUM_LAYERS
    ks = jax.random.split(key, 15)

    def u(k, shape, fan_in):
        bound = 1.0 / math.sqrt(fan_in)
        return jax.random.uniform(k, shape, jnp.float32, -bound, bound)

    # All weights kept in the PyTorch nn.Linear layout (out_features, in_features);
    # with tokens stored as columns, y_col = W @ x_col + b.
    w_x = u(ks[0], (H, 1), 1 + E)          # input_embedding column for the scalar x
    w_pe = u(ks[1], (H, E), 1 + E)         # input_embedding columns for the PE
    b_in = u(ks[2], (H, 1), 1 + E)

    w_qkv = u(ks[3], (L, 3 * H, H), H)     # [q; k; v] rows, heads contiguous inside
    b_qkv = u(ks[4], (L, 3 * H, 1), H)
    w_o = u(ks[5], (L, H, H), H)           # out_proj
    b_o = u(ks[6], (L, H, 1), H)

    ln1_w = jnp.ones((L, H, 1), jnp.float32)
    ln1_b = jnp.zeros((L, H, 1), jnp.float32)
    ln2_w = jnp.ones((L, H, 1), jnp.float32)
    ln2_b = jnp.zeros((L, H, 1), jnp.float32)

    ff1_w = u(ks[7], (L, H, H), H)         # dim_feedforward == hidden_size
    ff1_b = u(ks[8], (L, H, 1), H)
    ff2_w = u(ks[9], (L, H, H), H)
    ff2_b = u(ks[10], (L, H, 1), H)

    fc1_w = u(ks[11], (FC1_OUT, H), H)
    fc1_b = u(ks[12], (FC1_OUT, 1), H)
    fc2_w = u(ks[13], (FC1_OUT, 1), FC1_OUT)   # VPU multiply + sublane reduce
    fc2_b = u(ks[14], (1, 1), FC1_OUT)

    return (w_x, w_pe, b_in, w_qkv, b_qkv, w_o, b_o,
            ln1_w, ln1_b, ln2_w, ln2_b,
            ff1_w, ff1_b, ff2_w, ff2_b,
            fc1_w, fc1_b, fc2_w, fc2_b)


if __name__ == "__main__":
    key = jax.random.PRNGKey(0)
    kx, kp = jax.random.split(key)
    B, S = 2, 8                      # x: (batch, seq) of scalar readings
    x = jax.random.normal(kx, (B, S), jnp.float32)
    params = init_params(kp)

    out = jax.jit(transformer_forward)(x, params)
    jax.block_until_ready(out)
    assert out.shape == (B, S) and out.dtype == jnp.float32
    print("KERNEL_OK")
</pallas_src>

<mosaic_0001>
module attributes {stable_mosaic.version = 11 : i64} {
  func.func @transformer_kernel(%arg0: i32, %arg1: memref<2x8xf32, #tpu.memory_space<vmem>>, %arg2: memref<32x8xf32, #tpu.memory_space<vmem>>, %arg3: memref<24x1xf32, #tpu.memory_space<vmem>>, %arg4: memref<24x32xf32, #tpu.memory_space<vmem>>, %arg5: memref<24x1xf32, #tpu.memory_space<vmem>>, %arg6: memref<2x72x24xf32, #tpu.memory_space<vmem>>, %arg7: memref<2x72x1xf32, #tpu.memory_space<vmem>>, %arg8: memref<2x24x24xf32, #tpu.memory_space<vmem>>, %arg9: memref<2x24x1xf32, #tpu.memory_space<vmem>>, %arg10: memref<2x24x1xf32, #tpu.memory_space<vmem>>, %arg11: memref<2x24x1xf32, #tpu.memory_space<vmem>>, %arg12: memref<2x24x1xf32, #tpu.memory_space<vmem>>, %arg13: memref<2x24x1xf32, #tpu.memory_space<vmem>>, %arg14: memref<2x24x24xf32, #tpu.memory_space<vmem>>, %arg15: memref<2x24x1xf32, #tpu.memory_space<vmem>>, %arg16: memref<2x24x24xf32, #tpu.memory_space<vmem>>, %arg17: memref<2x24x1xf32, #tpu.memory_space<vmem>>, %arg18: memref<6x24xf32, #tpu.memory_space<vmem>>, %arg19: memref<6x1xf32, #tpu.memory_space<vmem>>, %arg20: memref<6x1xf32, #tpu.memory_space<vmem>>, %arg21: memref<1x1xf32, #tpu.memory_space<vmem>>, %arg22: memref<2x8xf32, #tpu.memory_space<vmem>>) attributes {dimension_semantics = [#tpu.dimension_semantics<parallel>], iteration_bounds = array<i64: 1>, scalar_prefetch = 0 : i64, scratch_operands = 0 : i64, tpu.core_type = #tpu.core_type<tc>, window_params = [{transform_indices = @transform_0, window_bounds = array<i64: 2, 8>}, {transform_indices = @transform_1, window_bounds = array<i64: 32, 8>}, {pipeline_mode = #tpu.pipeline_mode<synchronous>, transform_indices = @transform_2, window_bounds = array<i64: 24, 1>}, {pipeline_mode = #tpu.pipeline_mode<synchronous>, transform_indices = @transform_3, window_bounds = array<i64: 24, 32>}, {pipeline_mode = #tpu.pipeline_mode<synchronous>, transform_indices = @transform_4, window_bounds = array<i64: 24, 1>}, {pipeline_mode = #tpu.pipeline_mode<synchronous>, transform_indices = @transform_5, window_bounds = array<i64: 2, 72, 24>}, {pipeline_mode = #tpu.pipeline_mode<synchronous>, transform_indices = @transform_6, window_bounds = array<i64: 2, 72, 1>}, {pipeline_mode = #tpu.pipeline_mode<synchronous>, transform_indices = @transform_7, window_bounds = array<i64: 2, 24, 24>}, {pipeline_mode = #tpu.pipeline_mode<synchronous>, transform_indices = @transform_8, window_bounds = array<i64: 2, 24, 1>}, {pipeline_mode = #tpu.pipeline_mode<synchronous>, transform_indices = @transform_9, window_bounds = array<i64: 2, 24, 1>}, {pipeline_mode = #tpu.pipeline_mode<synchronous>, transform_indices = @transform_10, window_bounds = array<i64: 2, 24, 1>}, {pipeline_mode = #tpu.pipeline_mode<synchronous>, transform_indices = @transform_11, window_bounds = array<i64: 2, 24, 1>}, {pipeline_mode = #tpu.pipeline_mode<synchronous>, transform_indices = @transform_12, window_bounds = array<i64: 2, 24, 1>}, {pipeline_mode = #tpu.pipeline_mode<synchronous>, transform_indices = @transform_13, window_bounds = array<i64: 2, 24, 24>}, {pipeline_mode = #tpu.pipeline_mode<synchronous>, transform_indices = @transform_14, window_bounds = array<i64: 2, 24, 1>}, {pipeline_mode = #tpu.pipeline_mode<synchronous>, transform_indices = @transform_15, window_bounds = array<i64: 2, 24, 24>}, {pipeline_mode = #tpu.pipeline_mode<synchronous>, transform_indices = @transform_16, window_bounds = array<i64: 2, 24, 1>}, {pipeline_mode = #tpu.pipeline_mode<synchronous>, transform_indices = @transform_17, window_bounds = array<i64: 6, 24>}, {pipeline_mode = #tpu.pipeline_mode<synchronous>, transform_indices = @transform_18, window_bounds = array<i64: 6, 1>}, {pipeline_mode = #tpu.pipeline_mode<synchronous>, transform_indices = @transform_19, window_bounds = array<i64: 6, 1>}, {pipeline_mode = #tpu.pipeline_mode<synchronous>, transform_indices = @transform_20, window_bounds = array<i64: 1, 1>}, {transform_indices = @transform_21, window_bounds = array<i64: 2, 8>}]} {
    %c0 = arith.constant 0 : index
    %c0_0 = arith.constant 0 : index
    %0 = vector.load %arg1[%c0, %c0_0] : memref<2x8xf32, #tpu.memory_space<vmem>>, vector<2x8xf32>
    %c0_1 = arith.constant 0 : index
    %c0_2 = arith.constant 0 : index
    %1 = vector.load %arg2[%c0_1, %c0_2] : memref<32x8xf32, #tpu.memory_space<vmem>>, vector<32x8xf32>
    %c0_3 = arith.constant 0 : index
    %c0_4 = arith.constant 0 : index
    %2 = vector.load %arg4[%c0_3, %c0_4] : memref<24x32xf32, #tpu.memory_space<vmem>>, vector<24x32xf32>
    %cst = arith.constant dense<0.000000e+00> : vector<24x8xf32>
    %3 = tpu.matmul %2, %1, %cst {dimension_numbers = #tpu.dot_dimension_numbers<[1], [0], [0], [1], [0, 0, 1, 1], [], []>} : vector<24x32xf32>, vector<32x8xf32>, vector<24x8xf32> -> vector<24x8xf32>
    %c0_5 = arith.constant 0 : index
    %c0_6 = arith.constant 0 : index
    %4 = vector.load %arg5[%c0_5, %c0_6] : memref<24x1xf32, #tpu.memory_space<vmem>>, vector<24x1xf32>
    %5 = vector.broadcast %4 : vector<24x1xf32> to vector<24x8xf32>
    %6 = arith.addf %3, %5 : vector<24x8xf32>
    %c0_7 = arith.constant 0 : index
    %c0_8 = arith.constant 0 : index
    %7 = vector.load %arg3[%c0_7, %c0_8] : memref<24x1xf32, #tpu.memory_space<vmem>>, vector<24x1xf32>
    %8 = vector.extract_strided_slice %0 {offsets = [0, 0], sizes = [1, 8], strides = [1, 1]} : vector<2x8xf32> to vector<1x8xf32>
    %9 = vector.broadcast %7 : vector<24x1xf32> to vector<24x8xf32>
    %10 = vector.broadcast %8 : vector<1x8xf32> to vector<24x8xf32>
    %11 = arith.mulf %9, %10 : vector<24x8xf32>
    %12 = arith.addf %6, %11 : vector<24x8xf32>
    %13 = vector.extract_strided_slice %0 {offsets = [1, 0], sizes = [1, 8], strides = [1, 1]} : vector<2x8xf32> to vector<1x8xf32>
    %14 = vector.broadcast %7 : vector<24x1xf32> to vector<24x8xf32>
    %15 = vector.broadcast %13 : vector<1x8xf32> to vector<24x8xf32>
    %16 = arith.mulf %14, %15 : vector<24x8xf32>
    %17 = arith.addf %6, %16 : vector<24x8xf32>
    %18 = tpu.concatenate %12, %17 in 1 : vector<24x8xf32>, vector<24x8xf32> -> vector<24x16xf32>
    %c0_9 = arith.constant 0 : index
    %c0_10 = arith.constant 0 : index
    %c0_11 = arith.constant 0 : index
    %19 = vector.load %arg6[%c0_9, %c0_10, %c0_11] : memref<2x72x24xf32, #tpu.memory_space<vmem>>, vector<1x72x24xf32>
    %20 = vector.shape_cast %19 : vector<1x72x24xf32> to vector<72x24xf32>
    %cst_12 = arith.constant dense<0.000000e+00> : vector<72x16xf32>
    %21 = tpu.matmul %20, %18, %cst_12 {dimension_numbers = #tpu.dot_dimension_numbers<[1], [0], [0], [1], [0, 0, 1, 1], [], []>} : vector<72x24xf32>, vector<24x16xf32>, vector<72x16xf32> -> vector<72x16xf32>
    %c0_13 = arith.constant 0 : index
    %c0_14 = arith.constant 0 : index
    %c0_15 = arith.constant 0 : index
    %22 = vector.load %arg7[%c0_13, %c0_14, %c0_15] : memref<2x72x1xf32, #tpu.memory_space<vmem>>, vector<1x72x1xf32>
    %23 = vector.shape_cast %22 : vector<1x72x1xf32> to vector<72x1xf32>
    %24 = vector.broadcast %23 : vector<72x1xf32> to vector<72x16xf32>
    %25 = arith.addf %21, %24 : vector<72x16xf32>
    %26 = vector.extract_strided_slice %25 {offsets = [0, 0], sizes = [24, 16], strides = [1, 1]} : vector<72x16xf32> to vector<24x16xf32>
    %27 = vector.extract_strided_slice %25 {offsets = [24, 0], sizes = [24, 16], strides = [1, 1]} : vector<72x16xf32> to vector<24x16xf32>
    %28 = vector.extract_strided_slice %25 {offsets = [48, 0], sizes = [24, 16], strides = [1, 1]} : vector<72x16xf32> to vector<24x16xf32>
    %29 = vector.extract_strided_slice %26 {offsets = [0, 0], sizes = [12, 8], strides = [1, 1]} : vector<24x16xf32> to vector<12x8xf32>
    %30 = vector.extract_strided_slice %27 {offsets = [0, 0], sizes = [12, 8], strides = [1, 1]} : vector<24x16xf32> to vector<12x8xf32>
    %31 = vector.extract_strided_slice %27 {offsets = [0, 8], sizes = [12, 8], strides = [1, 1]} : vector<24x16xf32> to vector<12x8xf32>
    %32 = vector.extract_strided_slice %28 {offsets = [0, 0], sizes = [12, 8], strides = [1, 1]} : vector<24x16xf32> to vector<12x8xf32>
    %33 = vector.extract_strided_slice %28 {offsets = [0, 8], sizes = [12, 8], strides = [1, 1]} : vector<24x16xf32> to vector<12x8xf32>
    %34 = arith.mulf %29, %30 : vector<12x8xf32>
    %cst_16 = arith.constant dense<0.000000e+00> : vector<8xf32>
    %35 = vector.multi_reduction <add>, %34, %cst_16 [0] : vector<12x8xf32> to vector<8xf32>
    %36 = vector.shape_cast %35 : vector<8xf32> to vector<1x8xf32>
    %cst_17 = arith.constant 0.288675129 : f32
    %37 = vector.broadcast %cst_17 : f32 to vector<1x8xf32>
    %38 = arith.mulf %37, %36 : vector<1x8xf32>
    %39 = arith.mulf %29, %31 : vector<12x8xf32>
    %cst_18 = arith.constant dense<0.000000e+00> : vector<8xf32>
    %40 = vector.multi_reduction <add>, %39, %cst_18 [0] : vector<12x8xf32> to vector<8xf32>
    %41 = vector.shape_cast %40 : vector<8xf32> to vector<1x8xf32>
    %cst_19 = arith.constant 0.288675129 : f32
    %42 = vector.broadcast %cst_19 : f32 to vector<1x8xf32>
    %43 = arith.mulf %42, %41 : vector<1x8xf32>
    %44 = arith.subf %43, %38 : vector<1x8xf32>
    %45 = math.exp %44 : vector<1x8xf32>
    %cst_20 = arith.constant 1.000000e+00 : f32
    %46 = vector.broadcast %cst_20 : f32 to vector<1x8xf32>
    %47 = arith.addf %46, %45 : vector<1x8xf32>
    %48 = tpu.reciprocal %47 {approx = true} : vector<1x8xf32> -> vector<1x8xf32>
    %49 = arith.subf %32, %33 : vector<12x8xf32>
    %50 = vector.broadcast %48 : vector<1x8xf32> to vector<12x8xf32>
    %51 = arith.mulf %50, %49 : vector<12x8xf32>
    %52 = arith.addf %33, %51 : vector<12x8xf32>
    %53 = vector.extract_strided_slice %26 {offsets = [12, 0], sizes = [12, 8], strides = [1, 1]} : vector<24x16xf32> to vector<12x8xf32>
    %54 = vector.extract_strided_slice %27 {offsets = [12, 0], sizes = [12, 8], strides = [1, 1]} : vector<24x16xf32> to vector<12x8xf32>
    %55 = vector.extract_strided_slice %27 {offsets = [12, 8], sizes = [12, 8], strides = [1, 1]} : vector<24x16xf32> to vector<12x8xf32>
    %56 = vector.extract_strided_slice %28 {offsets = [12, 0], sizes = [12, 8], strides = [1, 1]} : vector<24x16xf32> to vector<12x8xf32>
    %57 = vector.extract_strided_slice %28 {offsets = [12, 8], sizes = [12, 8], strides = [1, 1]} : vector<24x16xf32> to vector<12x8xf32>
    %58 = arith.mulf %53, %54 : vector<12x8xf32>
    %cst_21 = arith.constant dense<0.000000e+00> : vector<8xf32>
    %59 = vector.multi_reduction <add>, %58, %cst_21 [0] : vector<12x8xf32> to vector<8xf32>
    %60 = vector.shape_cast %59 : vector<8xf32> to vector<1x8xf32>
    %cst_22 = arith.constant 0.288675129 : f32
    %61 = vector.broadcast %cst_22 : f32 to vector<1x8xf32>
    %62 = arith.mulf %61, %60 : vector<1x8xf32>
    %63 = arith.mulf %53, %55 : vector<12x8xf32>
    %cst_23 = arith.constant dense<0.000000e+00> : vector<8xf32>
    %64 = vector.multi_reduction <add>, %63, %cst_23 [0] : vector<12x8xf32> to vector<8xf32>
    %65 = vector.shape_cast %64 : vector<8xf32> to vector<1x8xf32>
    %cst_24 = arith.constant 0.288675129 : f32
    %66 = vector.broadcast %cst_24 : f32 to vector<1x8xf32>
    %67 = arith.mulf %66, %65 : vector<1x8xf32>
    %68 = arith.subf %67, %62 : vector<1x8xf32>
    %69 = math.exp %68 : vector<1x8xf32>
    %cst_25 = arith.constant 1.000000e+00 : f32
    %70 = vector.broadcast %cst_25 : f32 to vector<1x8xf32>
    %71 = arith.addf %70, %69 : vector<1x8xf32>
    %72 = tpu.reciprocal %71 {approx = true} : vector<1x8xf32> -> vector<1x8xf32>
    %73 = arith.subf %56, %57 : vector<12x8xf32>
    %74 = vector.broadcast %72 : vector<1x8xf32> to vector<12x8xf32>
    %75 = arith.mulf %74, %73 : vector<12x8xf32>
    %76 = arith.addf %57, %75 : vector<12x8xf32>
    %77 = tpu.concatenate %52, %76 in 0 : vector<12x8xf32>, vector<12x8xf32> -> vector<24x8xf32>
    %78 = vector.extract_strided_slice %26 {offsets = [0, 8], sizes = [12, 8], strides = [1, 1]} : vector<24x16xf32> to vector<12x8xf32>
    %79 = vector.extract_strided_slice %27 {offsets = [0, 0], sizes = [12, 8], strides = [1, 1]} : vector<24x16xf32> to vector<12x8xf32>
    %80 = vector.extract_strided_slice %27 {offsets = [0, 8], sizes = [12, 8], strides = [1, 1]} : vector<24x16xf32> to vector<12x8xf32>
    %81 = vector.extract_strided_slice %28 {offsets = [0, 0], sizes = [12, 8], strides = [1, 1]} : vector<24x16xf32> to vector<12x8xf32>
    %82 = vector.extract_strided_slice %28 {offsets = [0, 8], sizes = [12, 8], strides = [1, 1]} : vector<24x16xf32> to vector<12x8xf32>
    %83 = arith.mulf %78, %79 : vector<12x8xf32>
    %cst_26 = arith.constant dense<0.000000e+00> : vector<8xf32>
    %84 = vector.multi_reduction <add>, %83, %cst_26 [0] : vector<12x8xf32> to vector<8xf32>
    %85 = vector.shape_cast %84 : vector<8xf32> to vector<1x8xf32>
    %cst_27 = arith.constant 0.288675129 : f32
    %86 = vector.broadcast %cst_27 : f32 to vector<1x8xf32>
    %87 = arith.mulf %86, %85 : vector<1x8xf32>
    %88 = arith.mulf %78, %80 : vector<12x8xf32>
    %cst_28 = arith.constant dense<0.000000e+00> : vector<8xf32>
    %89 = vector.multi_reduction <add>, %88, %cst_28 [0] : vector<12x8xf32> to vector<8xf32>
    %90 = vector.shape_cast %89 : vector<8xf32> to vector<1x8xf32>
    %cst_29 = arith.constant 0.288675129 : f32
    %91 = vector.broadcast %cst_29 : f32 to vector<1x8xf32>
    %92 = arith.mulf %91, %90 : vector<1x8xf32>
    %93 = arith.subf %92, %87 : vector<1x8xf32>
    %94 = math.exp %93 : vector<1x8xf32>
    %cst_30 = arith.constant 1.000000e+00 : f32
    %95 = vector.broadcast %cst_30 : f32 to vector<1x8xf32>
    %96 = arith.addf %95, %94 : vector<1x8xf32>
    %97 = tpu.reciprocal %96 {approx = true} : vector<1x8xf32> -> vector<1x8xf32>
    %98 = arith.subf %81, %82 : vector<12x8xf32>
    %99 = vector.broadcast %97 : vector<1x8xf32> to vector<12x8xf32>
    %100 = arith.mulf %99, %98 : vector<12x8xf32>
    %101 = arith.addf %82, %100 : vector<12x8xf32>
    %102 = vector.extract_strided_slice %26 {offsets = [12, 8], sizes = [12, 8], strides = [1, 1]} : vector<24x16xf32> to vector<12x8xf32>
    %103 = vector.extract_strided_slice %27 {offsets = [12, 0], sizes = [12, 8], strides = [1, 1]} : vector<24x16xf32> to vector<12x8xf32>
    %104 = vector.extract_strided_slice %27 {offsets = [12, 8], sizes = [12, 8], strides = [1, 1]} : vector<24x16xf32> to vector<12x8xf32>
    %105 = vector.extract_strided_slice %28 {offsets = [12, 0], sizes = [12, 8], strides = [1, 1]} : vector<24x16xf32> to vector<12x8xf32>
    %106 = vector.extract_strided_slice %28 {offsets = [12, 8], sizes = [12, 8], strides = [1, 1]} : vector<24x16xf32> to vector<12x8xf32>
    %107 = arith.mulf %102, %103 : vector<12x8xf32>
    %cst_31 = arith.constant dense<0.000000e+00> : vector<8xf32>
    %108 = vector.multi_reduction <add>, %107, %cst_31 [0] : vector<12x8xf32> to vector<8xf32>
    %109 = vector.shape_cast %108 : vector<8xf32> to vector<1x8xf32>
    %cst_32 = arith.constant 0.288675129 : f32
    %110 = vector.broadcast %cst_32 : f32 to vector<1x8xf32>
    %111 = arith.mulf %110, %109 : vector<1x8xf32>
    %112 = arith.mulf %102, %104 : vector<12x8xf32>
    %cst_33 = arith.constant dense<0.000000e+00> : vector<8xf32>
    %113 = vector.multi_reduction <add>, %112, %cst_33 [0] : vector<12x8xf32> to vector<8xf32>
    %114 = vector.shape_cast %113 : vector<8xf32> to vector<1x8xf32>
    %cst_34 = arith.constant 0.288675129 : f32
    %115 = vector.broadcast %cst_34 : f32 to vector<1x8xf32>
    %116 = arith.mulf %115, %114 : vector<1x8xf32>
    %117 = arith.subf %116, %111 : vector<1x8xf32>
    %118 = math.exp %117 : vector<1x8xf32>
    %cst_35 = arith.constant 1.000000e+00 : f32
    %119 = vector.broadcast %cst_35 : f32 to vector<1x8xf32>
    %120 = arith.addf %119, %118 : vector<1x8xf32>
    %121 = tpu.reciprocal %120 {approx = true} : vector<1x8xf32> -> vector<1x8xf32>
    %122 = arith.subf %105, %106 : vector<12x8xf32>
    %123 = vector.broadcast %121 : vector<1x8xf32> to vector<12x8xf32>
    %124 = arith.mulf %123, %122 : vector<12x8xf32>
    %125 = arith.addf %106, %124 : vector<12x8xf32>
    %126 = tpu.concatenate %101, %125 in 0 : vector<12x8xf32>, vector<12x8xf32> -> vector<24x8xf32>
    %127 = tpu.concatenate %77, %126 in 1 : vector<24x8xf32>, vector<24x8xf32> -> vector<24x16xf32>
    %c0_36 = arith.constant 0 : index
    %c0_37 = arith.constant 0 : index
    %c0_38 = arith.constant 0 : index
    %128 = vector.load %arg8[%c0_36, %c0_37, %c0_38] : memref<2x24x24xf32, #tpu.memory_space<vmem>>, vector<1x24x24xf32>
    %129 = vector.shape_cast %128 : vector<1x24x24xf32> to vector<24x24xf32>
    %cst_39 = arith.constant dense<0.000000e+00> : vector<24x16xf32>
    %130 = tpu.matmul %129, %127, %cst_39 {dimension_numbers = #tpu.dot_dimension_numbers<[1], [0], [0], [1], [0, 0, 1, 1], [], []>} : vector<24x24xf32>, vector<24x16xf32>, vector<24x16xf32> -> vector<24x16xf32>
    %c0_40 = arith.constant 0 : index
    %c0_41 = arith.constant 0 : index
    %c0_42 = arith.constant 0 : index
    %131 = vector.load %arg9[%c0_40, %c0_41, %c0_42] : memref<2x24x1xf32, #tpu.memory_space<vmem>>, vector<1x24x1xf32>
    %132 = vector.shape_cast %131 : vector<1x24x1xf32> to vector<24x1xf32>
    %133 = vector.broadcast %132 : vector<24x1xf32> to vector<24x16xf32>
    %134 = arith.addf %130, %133 : vector<24x16xf32>
    %135 = arith.addf %18, %134 : vector<24x16xf32>
    %c0_43 = arith.constant 0 : index
    %c0_44 = arith.constant 0 : index
    %c0_45 = arith.constant 0 : index
    %136 = vector.load %arg10[%c0_43, %c0_44, %c0_45] : memref<2x24x1xf32, #tpu.memory_space<vmem>>, vector<1x24x1xf32>
    %137 = vector.shape_cast %136 : vector<1x24x1xf32> to vector<24x1xf32>
    %c0_46 = arith.constant 0 : index
    %c0_47 = arith.constant 0 : index
    %c0_48 = arith.constant 0 : index
    %138 = vector.load %arg11[%c0_46, %c0_47, %c0_48] : memref<2x24x1xf32, #tpu.memory_space<vmem>>, vector<1x24x1xf32>
    %139 = vector.shape_cast %138 : vector<1x24x1xf32> to vector<24x1xf32>
    %cst_49 = arith.constant dense<0.000000e+00> : vector<16xf32>
    %140 = vector.multi_reduction <add>, %135, %cst_49 [0] : vector<24x16xf32> to vector<16xf32>
    %141 = vector.shape_cast %140 : vector<16xf32> to vector<1x16xf32>
    %cst_50 = arith.constant 2.400000e+01 : f32
    %142 = vector.broadcast %cst_50 : f32 to vector<1x16xf32>
    %143 = arith.divf %141, %142 : vector<1x16xf32>
    %144 = vector.broadcast %143 : vector<1x16xf32> to vector<24x16xf32>
    %145 = arith.subf %135, %144 : vector<24x16xf32>
    %146 = arith.mulf %145, %145 : vector<24x16xf32>
    %cst_51 = arith.constant dense<0.000000e+00> : vector<16xf32>
    %147 = vector.multi_reduction <add>, %146, %cst_51 [0] : vector<24x16xf32> to vector<16xf32>
    %148 = vector.shape_cast %147 : vector<16xf32> to vector<1x16xf32>
    %cst_52 = arith.constant 2.400000e+01 : f32
    %149 = vector.broadcast %cst_52 : f32 to vector<1x16xf32>
    %150 = arith.divf %148, %149 : vector<1x16xf32>
    %cst_53 = arith.constant 9.99999974E-6 : f32
    %151 = vector.broadcast %cst_53 : f32 to vector<1x16xf32>
    %152 = arith.addf %150, %151 : vector<1x16xf32>
    %153 = math.rsqrt %152 : vector<1x16xf32>
    %154 = vector.broadcast %153 : vector<1x16xf32> to vector<24x16xf32>
    %155 = arith.mulf %145, %154 : vector<24x16xf32>
    %156 = vector.broadcast %137 : vector<24x1xf32> to vector<24x16xf32>
    %157 = arith.mulf %155, %156 : vector<24x16xf32>
    %158 = vector.broadcast %139 : vector<24x1xf32> to vector<24x16xf32>
    %159 = arith.addf %157, %158 : vector<24x16xf32>
    %c0_54 = arith.constant 0 : index
    %c0_55 = arith.constant 0 : index
    %c0_56 = arith.constant 0 : index
    %160 = vector.load %arg14[%c0_54, %c0_55, %c0_56] : memref<2x24x24xf32, #tpu.memory_space<vmem>>, vector<1x24x24xf32>
    %161 = vector.shape_cast %160 : vector<1x24x24xf32> to vector<24x24xf32>
    %cst_57 = arith.constant dense<0.000000e+00> : vector<24x16xf32>
    %162 = tpu.matmul %161, %159, %cst_57 {dimension_numbers = #tpu.dot_dimension_numbers<[1], [0], [0], [1], [0, 0, 1, 1], [], []>} : vector<24x24xf32>, vector<24x16xf32>, vector<24x16xf32> -> vector<24x16xf32>
    %c0_58 = arith.constant 0 : index
    %c0_59 = arith.constant 0 : index
    %c0_60 = arith.constant 0 : index
    %163 = vector.load %arg15[%c0_58, %c0_59, %c0_60] : memref<2x24x1xf32, #tpu.memory_space<vmem>>, vector<1x24x1xf32>
    %164 = vector.shape_cast %163 : vector<1x24x1xf32> to vector<24x1xf32>
    %165 = vector.broadcast %164 : vector<24x1xf32> to vector<24x16xf32>
    %166 = arith.addf %162, %165 : vector<24x16xf32>
    %cst_61 = arith.constant 0.000000e+00 : f32
    %167 = vector.broadcast %cst_61 : f32 to vector<24x16xf32>
    %168 = arith.maximumf %166, %167 : vector<24x16xf32>
    %c0_62 = arith.constant 0 : index
    %c0_63 = arith.constant 0 : index
    %c0_64 = arith.constant 0 : index
    %169 = vector.load %arg16[%c0_62, %c0_63, %c0_64] : memref<2x24x24xf32, #tpu.memory_space<vmem>>, vector<1x24x24xf32>
    %170 = vector.shape_cast %169 : vector<1x24x24xf32> to vector<24x24xf32>
    %cst_65 = arith.constant dense<0.000000e+00> : vector<24x16xf32>
    %171 = tpu.matmul %170, %168, %cst_65 {dimension_numbers = #tpu.dot_dimension_numbers<[1], [0], [0], [1], [0, 0, 1, 1], [], []>} : vector<24x24xf32>, vector<24x16xf32>, vector<24x16xf32> -> vector<24x16xf32>
    %c0_66 = arith.constant 0 : index
    %c0_67 = arith.constant 0 : index
    %c0_68 = arith.constant 0 : index
    %172 = vector.load %arg17[%c0_66, %c0_67, %c0_68] : memref<2x24x1xf32, #tpu.memory_space<vmem>>, vector<1x24x1xf32>
    %173 = vector.shape_cast %172 : vector<1x24x1xf32> to vector<24x1xf32>
    %174 = vector.broadcast %173 : vector<24x1xf32> to vector<24x16xf32>
    %175 = arith.addf %171, %174 : vector<24x16xf32>
    %176 = arith.addf %159, %175 : vector<24x16xf32>
    %c0_69 = arith.constant 0 : index
    %c0_70 = arith.constant 0 : index
    %c0_71 = arith.constant 0 : index
    %177 = vector.load %arg12[%c0_69, %c0_70, %c0_71] : memref<2x24x1xf32, #tpu.memory_space<vmem>>, vector<1x24x1xf32>
    %178 = vector.shape_cast %177 : vector<1x24x1xf32> to vector<24x1xf32>
    %c0_72 = arith.constant 0 : index
    %c0_73 = arith.constant 0 : index
    %c0_74 = arith.constant 0 : index
    %179 = vector.load %arg13[%c0_72, %c0_73, %c0_74] : memref<2x24x1xf32, #tpu.memory_space<vmem>>, vector<1x24x1xf32>
    %180 = vector.shape_cast %179 : vector<1x24x1xf32> to vector<24x1xf32>
    %cst_75 = arith.constant dense<0.000000e+00> : vector<16xf32>
    %181 = vector.multi_reduction <add>, %176, %cst_75 [0] : vector<24x16xf32> to vector<16xf32>
    %182 = vector.shape_cast %181 : vector<16xf32> to vector<1x16xf32>
    %cst_76 = arith.constant 2.400000e+01 : f32
    %183 = vector.broadcast %cst_76 : f32 to vector<1x16xf32>
    %184 = arith.divf %182, %183 : vector<1x16xf32>
    %185 = vector.broadcast %184 : vector<1x16xf32> to vector<24x16xf32>
    %186 = arith.subf %176, %185 : vector<24x16xf32>
    %187 = arith.mulf %186, %186 : vector<24x16xf32>
    %cst_77 = arith.constant dense<0.000000e+00> : vector<16xf32>
    %188 = vector.multi_reduction <add>, %187, %cst_77 [0] : vector<24x16xf32> to vector<16xf32>
    %189 = vector.shape_cast %188 : vector<16xf32> to vector<1x16xf32>
    %cst_78 = arith.constant 2.400000e+01 : f32
    %190 = vector.broadcast %cst_78 : f32 to vector<1x16xf32>
    %191 = arith.divf %189, %190 : vector<1x16xf32>
    %cst_79 = arith.constant 9.99999974E-6 : f32
    %192 = vector.broadcast %cst_79 : f32 to vector<1x16xf32>
    %193 = arith.addf %191, %192 : vector<1x16xf32>
    %194 = math.rsqrt %193 : vector<1x16xf32>
    %195 = vector.broadcast %194 : vector<1x16xf32> to vector<24x16xf32>
    %196 = arith.mulf %186, %195 : vector<24x16xf32>
    %197 = vector.broadcast %178 : vector<24x1xf32> to vector<24x16xf32>
    %198 = arith.mulf %196, %197 : vector<24x16xf32>
    %199 = vector.broadcast %180 : vector<24x1xf32> to vector<24x16xf32>
    %200 = arith.addf %198, %199 : vector<24x16xf32>
    %c1 = arith.constant 1 : index
    %c0_80 = arith.constant 0 : index
    %c0_81 = arith.constant 0 : index
    %201 = vector.load %arg6[%c1, %c0_80, %c0_81] : memref<2x72x24xf32, #tpu.memory_space<vmem>>, vector<1x72x24xf32>
    %202 = vector.shape_cast %201 : vector<1x72x24xf32> to vector<72x24xf32>
    %cst_82 = arith.constant dense<0.000000e+00> : vector<72x16xf32>
    %203 = tpu.matmul %202, %200, %cst_82 {dimension_numbers = #tpu.dot_dimension_numbers<[1], [0], [0], [1], [0, 0, 1, 1], [], []>} : vector<72x24xf32>, vector<24x16xf32>, vector<72x16xf32> -> vector<72x16xf32>
    %c1_83 = arith.constant 1 : index
    %c0_84 = arith.constant 0 : index
    %c0_85 = arith.constant 0 : index
    %204 = vector.load %arg7[%c1_83, %c0_84, %c0_85] : memref<2x72x1xf32, #tpu.memory_space<vmem>>, vector<1x72x1xf32>
    %205 = vector.shape_cast %204 : vector<1x72x1xf32> to vector<72x1xf32>
    %206 = vector.broadcast %205 : vector<72x1xf32> to vector<72x16xf32>
    %207 = arith.addf %203, %206 : vector<72x16xf32>
    %208 = vector.extract_strided_slice %207 {offsets = [0, 0], sizes = [24, 16], strides = [1, 1]} : vector<72x16xf32> to vector<24x16xf32>
    %209 = vector.extract_strided_slice %207 {offsets = [24, 0], sizes = [24, 16], strides = [1, 1]} : vector<72x16xf32> to vector<24x16xf32>
    %210 = vector.extract_strided_slice %207 {offsets = [48, 0], sizes = [24, 16], strides = [1, 1]} : vector<72x16xf32> to vector<24x16xf32>
    %211 = vector.extract_strided_slice %208 {offsets = [0, 0], sizes = [12, 8], strides = [1, 1]} : vector<24x16xf32> to vector<12x8xf32>
    %212 = vector.extract_strided_slice %209 {offsets = [0, 0], sizes = [12, 8], strides = [1, 1]} : vector<24x16xf32> to vector<12x8xf32>
    %213 = vector.extract_strided_slice %209 {offsets = [0, 8], sizes = [12, 8], strides = [1, 1]} : vector<24x16xf32> to vector<12x8xf32>
    %214 = vector.extract_strided_slice %210 {offsets = [0, 0], sizes = [12, 8], strides = [1, 1]} : vector<24x16xf32> to vector<12x8xf32>
    %215 = vector.extract_strided_slice %210 {offsets = [0, 8], sizes = [12, 8], strides = [1, 1]} : vector<24x16xf32> to vector<12x8xf32>
    %216 = arith.mulf %211, %212 : vector<12x8xf32>
    %cst_86 = arith.constant dense<0.000000e+00> : vector<8xf32>
    %217 = vector.multi_reduction <add>, %216, %cst_86 [0] : vector<12x8xf32> to vector<8xf32>
    %218 = vector.shape_cast %217 : vector<8xf32> to vector<1x8xf32>
    %cst_87 = arith.constant 0.288675129 : f32
    %219 = vector.broadcast %cst_87 : f32 to vector<1x8xf32>
    %220 = arith.mulf %219, %218 : vector<1x8xf32>
    %221 = arith.mulf %211, %213 : vector<12x8xf32>
    %cst_88 = arith.constant dense<0.000000e+00> : vector<8xf32>
    %222 = vector.multi_reduction <add>, %221, %cst_88 [0] : vector<12x8xf32> to vector<8xf32>
    %223 = vector.shape_cast %222 : vector<8xf32> to vector<1x8xf32>
    %cst_89 = arith.constant 0.288675129 : f32
    %224 = vector.broadcast %cst_89 : f32 to vector<1x8xf32>
    %225 = arith.mulf %224, %223 : vector<1x8xf32>
    %226 = arith.subf %225, %220 : vector<1x8xf32>
    %227 = math.exp %226 : vector<1x8xf32>
    %cst_90 = arith.constant 1.000000e+00 : f32
    %228 = vector.broadcast %cst_90 : f32 to vector<1x8xf32>
    %229 = arith.addf %228, %227 : vector<1x8xf32>
    %230 = tpu.reciprocal %229 {approx = true} : vector<1x8xf32> -> vector<1x8xf32>
    %231 = arith.subf %214, %215 : vector<12x8xf32>
    %232 = vector.broadcast %230 : vector<1x8xf32> to vector<12x8xf32>
    %233 = arith.mulf %232, %231 : vector<12x8xf32>
    %234 = arith.addf %215, %233 : vector<12x8xf32>
    %235 = vector.extract_strided_slice %208 {offsets = [12, 0], sizes = [12, 8], strides = [1, 1]} : vector<24x16xf32> to vector<12x8xf32>
    %236 = vector.extract_strided_slice %209 {offsets = [12, 0], sizes = [12, 8], strides = [1, 1]} : vector<24x16xf32> to vector<12x8xf32>
    %237 = vector.extract_strided_slice %209 {offsets = [12, 8], sizes = [12, 8], strides = [1, 1]} : vector<24x16xf32> to vector<12x8xf32>
    %238 = vector.extract_strided_slice %210 {offsets = [12, 0], sizes = [12, 8], strides = [1, 1]} : vector<24x16xf32> to vector<12x8xf32>
    %239 = vector.extract_strided_slice %210 {offsets = [12, 8], sizes = [12, 8], strides = [1, 1]} : vector<24x16xf32> to vector<12x8xf32>
    %240 = arith.mulf %235, %236 : vector<12x8xf32>
    %cst_91 = arith.constant dense<0.000000e+00> : vector<8xf32>
    %241 = vector.multi_reduction <add>, %240, %cst_91 [0] : vector<12x8xf32> to vector<8xf32>
    %242 = vector.shape_cast %241 : vector<8xf32> to vector<1x8xf32>
    %cst_92 = arith.constant 0.288675129 : f32
    %243 = vector.broadcast %cst_92 : f32 to vector<1x8xf32>
    %244 = arith.mulf %243, %242 : vector<1x8xf32>
    %245 = arith.mulf %235, %237 : vector<12x8xf32>
    %cst_93 = arith.constant dense<0.000000e+00> : vector<8xf32>
    %246 = vector.multi_reduction <add>, %245, %cst_93 [0] : vector<12x8xf32> to vector<8xf32>
    %247 = vector.shape_cast %246 : vector<8xf32> to vector<1x8xf32>
    %cst_94 = arith.constant 0.288675129 : f32
    %248 = vector.broadcast %cst_94 : f32 to vector<1x8xf32>
    %249 = arith.mulf %248, %247 : vector<1x8xf32>
    %250 = arith.subf %249, %244 : vector<1x8xf32>
    %251 = math.exp %250 : vector<1x8xf32>
    %cst_95 = arith.constant 1.000000e+00 : f32
    %252 = vector.broadcast %cst_95 : f32 to vector<1x8xf32>
    %253 = arith.addf %252, %251 : vector<1x8xf32>
    %254 = tpu.reciprocal %253 {approx = true} : vector<1x8xf32> -> vector<1x8xf32>
    %255 = arith.subf %238, %239 : vector<12x8xf32>
    %256 = vector.broadcast %254 : vector<1x8xf32> to vector<12x8xf32>
    %257 = arith.mulf %256, %255 : vector<12x8xf32>
    %258 = arith.addf %239, %257 : vector<12x8xf32>
    %259 = tpu.concatenate %234, %258 in 0 : vector<12x8xf32>, vector<12x8xf32> -> vector<24x8xf32>
    %260 = vector.extract_strided_slice %208 {offsets = [0, 8], sizes = [12, 8], strides = [1, 1]} : vector<24x16xf32> to vector<12x8xf32>
    %261 = vector.extract_strided_slice %209 {offsets = [0, 0], sizes = [12, 8], strides = [1, 1]} : vector<24x16xf32> to vector<12x8xf32>
    %262 = vector.extract_strided_slice %209 {offsets = [0, 8], sizes = [12, 8], strides = [1, 1]} : vector<24x16xf32> to vector<12x8xf32>
    %263 = vector.extract_strided_slice %210 {offsets = [0, 0], sizes = [12, 8], strides = [1, 1]} : vector<24x16xf32> to vector<12x8xf32>
    %264 = vector.extract_strided_slice %210 {offsets = [0, 8], sizes = [12, 8], strides = [1, 1]} : vector<24x16xf32> to vector<12x8xf32>
    %265 = arith.mulf %260, %261 : vector<12x8xf32>
    %cst_96 = arith.constant dense<0.000000e+00> : vector<8xf32>
    %266 = vector.multi_reduction <add>, %265, %cst_96 [0] : vector<12x8xf32> to vector<8xf32>
    %267 = vector.shape_cast %266 : vector<8xf32> to vector<1x8xf32>
    %cst_97 = arith.constant 0.288675129 : f32
    %268 = vector.broadcast %cst_97 : f32 to vector<1x8xf32>
    %269 = arith.mulf %268, %267 : vector<1x8xf32>
    %270 = arith.mulf %260, %262 : vector<12x8xf32>
    %cst_98 = arith.constant dense<0.000000e+00> : vector<8xf32>
    %271 = vector.multi_reduction <add>, %270, %cst_98 [0] : vector<12x8xf32> to vector<8xf32>
    %272 = vector.shape_cast %271 : vector<8xf32> to vector<1x8xf32>
    %cst_99 = arith.constant 0.288675129 : f32
    %273 = vector.broadcast %cst_99 : f32 to vector<1x8xf32>
    %274 = arith.mulf %273, %272 : vector<1x8xf32>
    %275 = arith.subf %274, %269 : vector<1x8xf32>
    %276 = math.exp %275 : vector<1x8xf32>
    %cst_100 = arith.constant 1.000000e+00 : f32
    %277 = vector.broadcast %cst_100 : f32 to vector<1x8xf32>
    %278 = arith.addf %277, %276 : vector<1x8xf32>
    %279 = tpu.reciprocal %278 {approx = true} : vector<1x8xf32> -> vector<1x8xf32>
    %280 = arith.subf %263, %264 : vector<12x8xf32>
    %281 = vector.broadcast %279 : vector<1x8xf32> to vector<12x8xf32>
    %282 = arith.mulf %281, %280 : vector<12x8xf32>
    %283 = arith.addf %264, %282 : vector<12x8xf32>
    %284 = vector.extract_strided_slice %208 {offsets = [12, 8], sizes = [12, 8], strides = [1, 1]} : vector<24x16xf32> to vector<12x8xf32>
    %285 = vector.extract_strided_slice %209 {offsets = [12, 0], sizes = [12, 8], strides = [1, 1]} : vector<24x16xf32> to vector<12x8xf32>
    %286 = vector.extract_strided_slice %209 {offsets = [12, 8], sizes = [12, 8], strides = [1, 1]} : vector<24x16xf32> to vector<12x8xf32>
    %287 = vector.extract_strided_slice %210 {offsets = [12, 0], sizes = [12, 8], strides = [1, 1]} : vector<24x16xf32> to vector<12x8xf32>
    %288 = vector.extract_strided_slice %210 {offsets = [12, 8], sizes = [12, 8], strides = [1, 1]} : vector<24x16xf32> to vector<12x8xf32>
    %289 = arith.mulf %284, %285 : vector<12x8xf32>
    %cst_101 = arith.constant dense<0.000000e+00> : vector<8xf32>
    %290 = vector.multi_reduction <add>, %289, %cst_101 [0] : vector<12x8xf32> to vector<8xf32>
    %291 = vector.shape_cast %290 : vector<8xf32> to vector<1x8xf32>
    %cst_102 = arith.constant 0.288675129 : f32
    %292 = vector.broadcast %cst_102 : f32 to vector<1x8xf32>
    %293 = arith.mulf %292, %291 : vector<1x8xf32>
    %294 = arith.mulf %284, %286 : vector<12x8xf32>
    %cst_103 = arith.constant dense<0.000000e+00> : vector<8xf32>
    %295 = vector.multi_reduction <add>, %294, %cst_103 [0] : vector<12x8xf32> to vector<8xf32>
    %296 = vector.shape_cast %295 : vector<8xf32> to vector<1x8xf32>
    %cst_104 = arith.constant 0.288675129 : f32
    %297 = vector.broadcast %cst_104 : f32 to vector<1x8xf32>
    %298 = arith.mulf %297, %296 : vector<1x8xf32>
    %299 = arith.subf %298, %293 : vector<1x8xf32>
    %300 = math.exp %299 : vector<1x8xf32>
    %cst_105 = arith.constant 1.000000e+00 : f32
    %301 = vector.broadcast %cst_105 : f32 to vector<1x8xf32>
    %302 = arith.addf %301, %300 : vector<1x8xf32>
    %303 = tpu.reciprocal %302 {approx = true} : vector<1x8xf32> -> vector<1x8xf32>
    %304 = arith.subf %287, %288 : vector<12x8xf32>
    %305 = vector.broadcast %303 : vector<1x8xf32> to vector<12x8xf32>
    %306 = arith.mulf %305, %304 : vector<12x8xf32>
    %307 = arith.addf %288, %306 : vector<12x8xf32>
    %308 = tpu.concatenate %283, %307 in 0 : vector<12x8xf32>, vector<12x8xf32> -> vector<24x8xf32>
    %309 = tpu.concatenate %259, %308 in 1 : vector<24x8xf32>, vector<24x8xf32> -> vector<24x16xf32>
    %c1_106 = arith.constant 1 : index
    %c0_107 = arith.constant 0 : index
    %c0_108 = arith.constant 0 : index
    %310 = vector.load %arg8[%c1_106, %c0_107, %c0_108] : memref<2x24x24xf32, #tpu.memory_space<vmem>>, vector<1x24x24xf32>
    %311 = vector.shape_cast %310 : vector<1x24x24xf32> to vector<24x24xf32>
    %cst_109 = arith.constant dense<0.000000e+00> : vector<24x16xf32>
    %312 = tpu.matmul %311, %309, %cst_109 {dimension_numbers = #tpu.dot_dimension_numbers<[1], [0], [0], [1], [0, 0, 1, 1], [], []>} : vector<24x24xf32>, vector<24x16xf32>, vector<24x16xf32> -> vector<24x16xf32>
    %c1_110 = arith.constant 1 : index
    %c0_111 = arith.constant 0 : index
    %c0_112 = arith.constant 0 : index
    %313 = vector.load %arg9[%c1_110, %c0_111, %c0_112] : memref<2x24x1xf32, #tpu.memory_space<vmem>>, vector<1x24x1xf32>
    %314 = vector.shape_cast %313 : vector<1x24x1xf32> to vector<24x1xf32>
    %315 = vector.broadcast %314 : vector<24x1xf32> to vector<24x16xf32>
    %316 = arith.addf %312, %315 : vector<24x16xf32>
    %317 = arith.addf %200, %316 : vector<24x16xf32>
    %c1_113 = arith.constant 1 : index
    %c0_114 = arith.constant 0 : index
    %c0_115 = arith.constant 0 : index
    %318 = vector.load %arg10[%c1_113, %c0_114, %c0_115] : memref<2x24x1xf32, #tpu.memory_space<vmem>>, vector<1x24x1xf32>
    %319 = vector.shape_cast %318 : vector<1x24x1xf32> to vector<24x1xf32>
    %c1_116 = arith.constant 1 : index
    %c0_117 = arith.constant 0 : index
    %c0_118 = arith.constant 0 : index
    %320 = vector.load %arg11[%c1_116, %c0_117, %c0_118] : memref<2x24x1xf32, #tpu.memory_space<vmem>>, vector<1x24x1xf32>
    %321 = vector.shape_cast %320 : vector<1x24x1xf32> to vector<24x1xf32>
    %cst_119 = arith.constant dense<0.000000e+00> : vector<16xf32>
    %322 = vector.multi_reduction <add>, %317, %cst_119 [0] : vector<24x16xf32> to vector<16xf32>
    %323 = vector.shape_cast %322 : vector<16xf32> to vector<1x16xf32>
    %cst_120 = arith.constant 2.400000e+01 : f32
    %324 = vector.broadcast %cst_120 : f32 to vector<1x16xf32>
    %325 = arith.divf %323, %324 : vector<1x16xf32>
    %326 = vector.broadcast %325 : vector<1x16xf32> to vector<24x16xf32>
    %327 = arith.subf %317, %326 : vector<24x16xf32>
    %328 = arith.mulf %327, %327 : vector<24x16xf32>
    %cst_121 = arith.constant dense<0.000000e+00> : vector<16xf32>
    %329 = vector.multi_reduction <add>, %328, %cst_121 [0] : vector<24x16xf32> to vector<16xf32>
    %330 = vector.shape_cast %329 : vector<16xf32> to vector<1x16xf32>
    %cst_122 = arith.constant 2.400000e+01 : f32
    %331 = vector.broadcast %cst_122 : f32 to vector<1x16xf32>
    %332 = arith.divf %330, %331 : vector<1x16xf32>
    %cst_123 = arith.constant 9.99999974E-6 : f32
    %333 = vector.broadcast %cst_123 : f32 to vector<1x16xf32>
    %334 = arith.addf %332, %333 : vector<1x16xf32>
    %335 = math.rsqrt %334 : vector<1x16xf32>
    %336 = vector.broadcast %335 : vector<1x16xf32> to vector<24x16xf32>
    %337 = arith.mulf %327, %336 : vector<24x16xf32>
    %338 = vector.broadcast %319 : vector<24x1xf32> to vector<24x16xf32>
    %339 = arith.mulf %337, %338 : vector<24x16xf32>
    %340 = vector.broadcast %321 : vector<24x1xf32> to vector<24x16xf32>
    %341 = arith.addf %339, %340 : vector<24x16xf32>
    %c1_124 = arith.constant 1 : index
    %c0_125 = arith.constant 0 : index
    %c0_126 = arith.constant 0 : index
    %342 = vector.load %arg14[%c1_124, %c0_125, %c0_126] : memref<2x24x24xf32, #tpu.memory_space<vmem>>, vector<1x24x24xf32>
    %343 = vector.shape_cast %342 : vector<1x24x24xf32> to vector<24x24xf32>
    %cst_127 = arith.constant dense<0.000000e+00> : vector<24x16xf32>
    %344 = tpu.matmul %343, %341, %cst_127 {dimension_numbers = #tpu.dot_dimension_numbers<[1], [0], [0], [1], [0, 0, 1, 1], [], []>} : vector<24x24xf32>, vector<24x16xf32>, vector<24x16xf32> -> vector<24x16xf32>
    %c1_128 = arith.constant 1 : index
    %c0_129 = arith.constant 0 : index
    %c0_130 = arith.constant 0 : index
    %345 = vector.load %arg15[%c1_128, %c0_129, %c0_130] : memref<2x24x1xf32, #tpu.memory_space<vmem>>, vector<1x24x1xf32>
    %346 = vector.shape_cast %345 : vector<1x24x1xf32> to vector<24x1xf32>
    %347 = vector.broadcast %346 : vector<24x1xf32> to vector<24x16xf32>
    %348 = arith.addf %344, %347 : vector<24x16xf32>
    %cst_131 = arith.constant 0.000000e+00 : f32
    %349 = vector.broadcast %cst_131 : f32 to vector<24x16xf32>
    %350 = arith.maximumf %348, %349 : vector<24x16xf32>
    %c1_132 = arith.constant 1 : index
    %c0_133 = arith.constant 0 : index
    %c0_134 = arith.constant 0 : index
    %351 = vector.load %arg16[%c1_132, %c0_133, %c0_134] : memref<2x24x24xf32, #tpu.memory_space<vmem>>, vector<1x24x24xf32>
    %352 = vector.shape_cast %351 : vector<1x24x24xf32> to vector<24x24xf32>
    %cst_135 = arith.constant dense<0.000000e+00> : vector<24x16xf32>
    %353 = tpu.matmul %352, %350, %cst_135 {dimension_numbers = #tpu.dot_dimension_numbers<[1], [0], [0], [1], [0, 0, 1, 1], [], []>} : vector<24x24xf32>, vector<24x16xf32>, vector<24x16xf32> -> vector<24x16xf32>
    %c1_136 = arith.constant 1 : index
    %c0_137 = arith.constant 0 : index
    %c0_138 = arith.constant 0 : index
    %354 = vector.load %arg17[%c1_136, %c0_137, %c0_138] : memref<2x24x1xf32, #tpu.memory_space<vmem>>, vector<1x24x1xf32>
    %355 = vector.shape_cast %354 : vector<1x24x1xf32> to vector<24x1xf32>
    %356 = vector.broadcast %355 : vector<24x1xf32> to vector<24x16xf32>
    %357 = arith.addf %353, %356 : vector<24x16xf32>
    %358 = arith.addf %341, %357 : vector<24x16xf32>
    %c1_139 = arith.constant 1 : index
    %c0_140 = arith.constant 0 : index
    %c0_141 = arith.constant 0 : index
    %359 = vector.load %arg12[%c1_139, %c0_140, %c0_141] : memref<2x24x1xf32, #tpu.memory_space<vmem>>, vector<1x24x1xf32>
    %360 = vector.shape_cast %359 : vector<1x24x1xf32> to vector<24x1xf32>
    %c1_142 = arith.constant 1 : index
    %c0_143 = arith.constant 0 : index
    %c0_144 = arith.constant 0 : index
    %361 = vector.load %arg13[%c1_142, %c0_143, %c0_144] : memref<2x24x1xf32, #tpu.memory_space<vmem>>, vector<1x24x1xf32>
    %362 = vector.shape_cast %361 : vector<1x24x1xf32> to vector<24x1xf32>
    %cst_145 = arith.constant dense<0.000000e+00> : vector<16xf32>
    %363 = vector.multi_reduction <add>, %358, %cst_145 [0] : vector<24x16xf32> to vector<16xf32>
    %364 = vector.shape_cast %363 : vector<16xf32> to vector<1x16xf32>
    %cst_146 = arith.constant 2.400000e+01 : f32
    %365 = vector.broadcast %cst_146 : f32 to vector<1x16xf32>
    %366 = arith.divf %364, %365 : vector<1x16xf32>
    %367 = vector.broadcast %366 : vector<1x16xf32> to vector<24x16xf32>
    %368 = arith.subf %358, %367 : vector<24x16xf32>
    %369 = arith.mulf %368, %368 : vector<24x16xf32>
    %cst_147 = arith.constant dense<0.000000e+00> : vector<16xf32>
    %370 = vector.multi_reduction <add>, %369, %cst_147 [0] : vector<24x16xf32> to vector<16xf32>
    %371 = vector.shape_cast %370 : vector<16xf32> to vector<1x16xf32>
    %cst_148 = arith.constant 2.400000e+01 : f32
    %372 = vector.broadcast %cst_148 : f32 to vector<1x16xf32>
    %373 = arith.divf %371, %372 : vector<1x16xf32>
    %cst_149 = arith.constant 9.99999974E-6 : f32
    %374 = vector.broadcast %cst_149 : f32 to vector<1x16xf32>
    %375 = arith.addf %373, %374 : vector<1x16xf32>
    %376 = math.rsqrt %375 : vector<1x16xf32>
    %377 = vector.broadcast %376 : vector<1x16xf32> to vector<24x16xf32>
    %378 = arith.mulf %368, %377 : vector<24x16xf32>
    %379 = vector.broadcast %360 : vector<24x1xf32> to vector<24x16xf32>
    %380 = arith.mulf %378, %379 : vector<24x16xf32>
    %381 = vector.broadcast %362 : vector<24x1xf32> to vector<24x16xf32>
    %382 = arith.addf %380, %381 : vector<24x16xf32>
    %c0_150 = arith.constant 0 : index
    %c0_151 = arith.constant 0 : index
    %383 = vector.load %arg18[%c0_150, %c0_151] : memref<6x24xf32, #tpu.memory_space<vmem>>, vector<6x24xf32>
    %cst_152 = arith.constant dense<0.000000e+00> : vector<6x16xf32>
    %384 = tpu.matmul %383, %382, %cst_152 {dimension_numbers = #tpu.dot_dimension_numbers<[1], [0], [0], [1], [0, 0, 1, 1], [], []>} : vector<6x24xf32>, vector<24x16xf32>, vector<6x16xf32> -> vector<6x16xf32>
    %c0_153 = arith.constant 0 : index
    %c0_154 = arith.constant 0 : index
    %385 = vector.load %arg19[%c0_153, %c0_154] : memref<6x1xf32, #tpu.memory_space<vmem>>, vector<6x1xf32>
    %386 = vector.broadcast %385 : vector<6x1xf32> to vector<6x16xf32>
    %387 = arith.addf %384, %386 : vector<6x16xf32>
    %388 = math.tanh %387 : vector<6x16xf32>
    %c0_155 = arith.constant 0 : index
    %c0_156 = arith.constant 0 : index
    %389 = vector.load %arg20[%c0_155, %c0_156] : memref<6x1xf32, #tpu.memory_space<vmem>>, vector<6x1xf32>
    %390 = vector.broadcast %389 : vector<6x1xf32> to vector<6x16xf32>
    %391 = arith.mulf %388, %390 : vector<6x16xf32>
    %cst_157 = arith.constant dense<0.000000e+00> : vector<16xf32>
    %392 = vector.multi_reduction <add>, %391, %cst_157 [0] : vector<6x16xf32> to vector<16xf32>
    %393 = vector.shape_cast %392 : vector<16xf32> to vector<1x16xf32>
    %c0_158 = arith.constant 0 : index
    %c0_159 = arith.constant 0 : index
    %394 = vector.load %arg21[%c0_158, %c0_159] : memref<1x1xf32, #tpu.memory_space<vmem>>, vector<1x1xf32>
    %395 = vector.broadcast %394 : vector<1x1xf32> to vector<1x16xf32>
    %396 = arith.addf %393, %395 : vector<1x16xf32>
    %397 = vector.extract_strided_slice %396 {offsets = [0, 0], sizes = [1, 8], strides = [1, 1]} : vector<1x16xf32> to vector<1x8xf32>
    %c0_160 = arith.constant 0 : index
    %c0_161 = arith.constant 0 : index
    %398 = vector.load %arg22[%c0_160, %c0_161] : memref<2x8xf32, #tpu.memory_space<vmem>>, vector<1x8xf32>
    tpu.vector_store %arg22[%c0_160, %c0_161], %397 {strides = array<i32>} : memref<2x8xf32, #tpu.memory_space<vmem>>, vector<1x8xf32>,
    %399 = vector.extract_strided_slice %396 {offsets = [0, 8], sizes = [1, 8], strides = [1, 1]} : vector<1x16xf32> to vector<1x8xf32>
    %c1_162 = arith.constant 1 : index
    %c0_163 = arith.constant 0 : index
    %400 = vector.load %arg22[%c1_162, %c0_163] : memref<2x8xf32, #tpu.memory_space<vmem>>, vector<1x8xf32>
    tpu.vector_store %arg22[%c1_162, %c0_163], %399 {strides = array<i32>} : memref<2x8xf32, #tpu.memory_space<vmem>>, vector<1x8xf32>,
    return
  }
  func.func @transform_0(%arg0: i32) -> (i32, i32) {
    %c0_i32 = arith.constant 0 : i32
    %c0_i32_0 = arith.constant 0 : i32
    return %c0_i32, %arg0 : i32, i32
  }
  func.func @transform_1(%arg0: i32) -> (i32, i32) {
    %c0_i32 = arith.constant 0 : i32
    %c0_i32_0 = arith.constant 0 : i32
    return %c0_i32, %arg0 : i32, i32
  }
  func.func @transform_2(%arg0: i32) -> (i32, i32) {
    %c0_i32 = arith.constant 0 : i32
    %c0_i32_0 = arith.constant 0 : i32
    %c0_i32_1 = arith.constant 0 : i32
    return %c0_i32, %c0_i32_0 : i32, i32
  }
  func.func @transform_3(%arg0: i32) -> (i32, i32) {
    %c0_i32 = arith.constant 0 : i32
    %c0_i32_0 = arith.constant 0 : i32
    %c0_i32_1 = arith.constant 0 : i32
    return %c0_i32, %c0_i32_0 : i32, i32
  }
  func.func @transform_4(%arg0: i32) -> (i32, i32) {
    %c0_i32 = arith.constant 0 : i32
    %c0_i32_0 = arith.constant 0 : i32
    %c0_i32_1 = arith.constant 0 : i32
    return %c0_i32, %c0_i32_0 : i32, i32
  }
  func.func @transform_5(%arg0: i32) -> (i32, i32, i32) {
    %c0_i32 = arith.constant 0 : i32
    %c0_i32_0 = arith.constant 0 : i32
    %c0_i32_1 = arith.constant 0 : i32
    %c0_i32_2 = arith.constant 0 : i32
    return %c0_i32, %c0_i32_0, %c0_i32_1 : i32, i32, i32
  }
  func.func @transform_6(%arg0: i32) -> (i32, i32, i32) {
    %c0_i32 = arith.constant 0 : i32
    %c0_i32_0 = arith.constant 0 : i32
    %c0_i32_1 = arith.constant 0 : i32
    %c0_i32_2 = arith.constant 0 : i32
    return %c0_i32, %c0_i32_0, %c0_i32_1 : i32, i32, i32
  }
  func.func @transform_7(%arg0: i32) -> (i32, i32, i32) {
    %c0_i32 = arith.constant 0 : i32
    %c0_i32_0 = arith.constant 0 : i32
    %c0_i32_1 = arith.constant 0 : i32
    %c0_i32_2 = arith.constant 0 : i32
    return %c0_i32, %c0_i32_0, %c0_i32_1 : i32, i32, i32
  }
  func.func @transform_8(%arg0: i32) -> (i32, i32, i32) {
    %c0_i32 = arith.constant 0 : i32
    %c0_i32_0 = arith.constant 0 : i32
    %c0_i32_1 = arith.constant 0 : i32
    %c0_i32_2 = arith.constant 0 : i32
    return %c0_i32, %c0_i32_0, %c0_i32_1 : i32, i32, i32
  }
  func.func @transform_9(%arg0: i32) -> (i32, i32, i32) {
    %c0_i32 = arith.constant 0 : i32
    %c0_i32_0 = arith.constant 0 : i32
    %c0_i32_1 = arith.constant 0 : i32
    %c0_i32_2 = arith.constant 0 : i32
    return %c0_i32, %c0_i32_0, %c0_i32_1 : i32, i32, i32
  }
  func.func @transform_10(%arg0: i32) -> (i32, i32, i32) {
    %c0_i32 = arith.constant 0 : i32
    %c0_i32_0 = arith.constant 0 : i32
    %c0_i32_1 = arith.constant 0 : i32
    %c0_i32_2 = arith.constant 0 : i32
    return %c0_i32, %c0_i32_0, %c0_i32_1 : i32, i32, i32
  }
  func.func @transform_11(%arg0: i32) -> (i32, i32, i32) {
    %c0_i32 = arith.constant 0 : i32
    %c0_i32_0 = arith.constant 0 : i32
    %c0_i32_1 = arith.constant 0 : i32
    %c0_i32_2 = arith.constant 0 : i32
    return %c0_i32, %c0_i32_0, %c0_i32_1 : i32, i32, i32
  }
  func.func @transform_12(%arg0: i32) -> (i32, i32, i32) {
    %c0_i32 = arith.constant 0 : i32
    %c0_i32_0 = arith.constant 0 : i32
    %c0_i32_1 = arith.constant 0 : i32
    %c0_i32_2 = arith.constant 0 : i32
    return %c0_i32, %c0_i32_0, %c0_i32_1 : i32, i32, i32
  }
  func.func @transform_13(%arg0: i32) -> (i32, i32, i32) {
    %c0_i32 = arith.constant 0 : i32
    %c0_i32_0 = arith.constant 0 : i32
    %c0_i32_1 = arith.constant 0 : i32
    %c0_i32_2 = arith.constant 0 : i32
    return %c0_i32, %c0_i32_0, %c0_i32_1 : i32, i32, i32
  }
  func.func @transform_14(%arg0: i32) -> (i32, i32, i32) {
    %c0_i32 = arith.constant 0 : i32
    %c0_i32_0 = arith.constant 0 : i32
    %c0_i32_1 = arith.constant 0 : i32
    %c0_i32_2 = arith.constant 0 : i32
    return %c0_i32, %c0_i32_0, %c0_i32_1 : i32, i32, i32
  }
  func.func @transform_15(%arg0: i32) -> (i32, i32, i32) {
    %c0_i32 = arith.constant 0 : i32
    %c0_i32_0 = arith.constant 0 : i32
    %c0_i32_1 = arith.constant 0 : i32
    %c0_i32_2 = arith.constant 0 : i32
    return %c0_i32, %c0_i32_0, %c0_i32_1 : i32, i32, i32
  }
  func.func @transform_16(%arg0: i32) -> (i32, i32, i32) {
    %c0_i32 = arith.constant 0 : i32
    %c0_i32_0 = arith.constant 0 : i32
    %c0_i32_1 = arith.constant 0 : i32
    %c0_i32_2 = arith.constant 0 : i32
    return %c0_i32, %c0_i32_0, %c0_i32_1 : i32, i32, i32
  }
  func.func @transform_17(%arg0: i32) -> (i32, i32) {
    %c0_i32 = arith.constant 0 : i32
    %c0_i32_0 = arith.constant 0 : i32
    %c0_i32_1 = arith.constant 0 : i32
    return %c0_i32, %c0_i32_0 : i32, i32
  }
  func.func @transform_18(%arg0: i32) -> (i32, i32) {
    %c0_i32 = arith.constant 0 : i32
    %c0_i32_0 = arith.constant 0 : i32
    %c0_i32_1 = arith.constant 0 : i32
    return %c0_i32, %c0_i32_0 : i32, i32
  }
  func.func @transform_19(%arg0: i32) -> (i32, i32) {
    %c0_i32 = arith.constant 0 : i32
    %c0_i32_0 = arith.constant 0 : i32
    %c0_i32_1 = arith.constant 0 : i32
    return %c0_i32, %c0_i32_0 : i32, i32
  }
  func.func @transform_20(%arg0: i32) -> (i32, i32) {
    %c0_i32 = arith.constant 0 : i32
    %c0_i32_0 = arith.constant 0 : i32
    %c0_i32_1 = arith.constant 0 : i32
    return %c0_i32, %c0_i32_0 : i32, i32
  }
  func.func @transform_21(%arg0: i32) -> (i32, i32) {
    %c0_i32 = arith.constant 0 : i32
    %c0_i32_0 = arith.constant 0 : i32
    return %c0_i32, %arg0 : i32, i32
  }
}

</mosaic_0001>

<bundles_post_ra>
// kernel: transformer_forward.1
= control target key start
LH: loop header
LB: loop body
LE: loop exit
PB: predicated region body
PF: predicated region fallthrough
CT: control target
= control target key end

     0   :  { %s3590_s0 = inlined_call_operand.vmem [shape: f32[2,8], index: 0, kind: input, shape index: {}]   ;;  %s3591_s1 = inlined_call_operand.vmem [shape: f32[32,8], index: 1, kind: input, shape index: {}]   ;;  %s3592_s2 = inlined_call_operand.vmem [shape: f32[24,1], index: 2, kind: input, shape index: {}]   ;;  %s3593_s3 = inlined_call_operand.vmem [shape: f32[24,32], index: 3, kind: input, shape index: {}]   ;;  %s3594_s4 = inlined_call_operand.vmem [shape: f32[24,1], index: 4, kind: input, shape index: {}]   ;;  %s3595_s5 = inlined_call_operand.vmem [shape: f32[2,72,24], index: 5, kind: input, shape index: {}]   ;;  %s3596_s6 = inlined_call_operand.vmem [shape: f32[2,72,1], index: 6, kind: input, shape index: {}]   ;;  %s3597_s7 = inlined_call_operand.vmem [shape: f32[2,24,24], index: 7, kind: input, shape index: {}]   ;;  %s3598_s8 = inlined_call_operand.vmem [shape: f32[2,24,1], index: 8, kind: input, shape index: {}]   ;;  %s3599_s9 = inlined_call_operand.vmem [shape: f32[2,24,1], index: 9, kind: input, shape index: {}]   ;;  %s3600_s10 = inlined_call_operand.vmem [shape: f32[2,24,1], index: 10, kind: input, shape index: {}]   ;;  %s3601_s11 = inlined_call_operand.vmem [shape: f32[2,24,1], index: 11, kind: input, shape index: {}]   ;;  %s3602_s12 = inlined_call_operand.vmem [shape: f32[2,24,1], index: 12, kind: input, shape index: {}]   ;;  %s3603_s13 = inlined_call_operand.vmem [shape: f32[2,24,24], index: 13, kind: input, shape index: {}]   ;;  %s3604_s14 = inlined_call_operand.vmem [shape: f32[2,24,1], index: 14, kind: input, shape index: {}]   ;;  %s3605_s15 = inlined_call_operand.vmem [shape: f32[2,24,24], index: 15, kind: input, shape index: {}]   ;;  %s3606_s16 = inlined_call_operand.vmem [shape: f32[2,24,1], index: 16, kind: input, shape index: {}]   ;;  %s3607_s17 = inlined_call_operand.vmem [shape: f32[6,24], index: 17, kind: input, shape index: {}]   ;;  %s3608_s18 = inlined_call_operand.vmem [shape: f32[6,1], index: 18, kind: input, shape index: {}]   ;;  %s3609_s19 = inlined_call_operand.vmem [shape: f32[6,1], index: 19, kind: input, shape index: {}]   ;;  %s3610_s20 = inlined_call_operand.<no memory space> [shape: f32[1,1], index: 20, kind: input, shape index: {}]   ;;  %s3611_s21 = inlined_call_operand.hbm [shape: f32[2,8], index: 21, kind: output, shape index: {}]  }
   0x1   :  { %3617 = sst [smem:[#allocation6_spill]] %s3590_s0  ;;  %v26_v0 = vstv %s3610_s20 }
   0x2   :  { %3618 = sst [smem:[#allocation7_spill]] %s3591_s1  ;;  %27 = vst [vmem:[#allocation2] sm:$0x1] %v26_v0 }
   0x3   :  { %3619 = sst [smem:[#allocation8_spill]] %s3592_s2 }
   0x4   :  { %3620 = sst [smem:[#allocation9_spill]] %s3593_s3 }
   0x5   :  { %3621 = sst [smem:[#allocation10_spill]] %s3594_s4 }
   0x6   :  { %3622 = sst [smem:[#allocation11_spill]] %s3595_s5 }
   0x7   :  { %s3623_s3 = sld [smem:[#allocation7_spill]]  ;;  %v2713_v4 = vmov 0.0|0.0   ;;  %vm2714_vm0 = vmmov 0   ;;  %v2715_v7 = vmov 0.0   ;;  %v2716_v8 = vmov 0   ;;  %s3624_s23 = sld [smem:[#allocation8_spill]] }
   0x8   :  { %2595 = vmatprep.subr.bf16.mxu0 %v2713_v4  ;;  %2421 = vmatprep.mubr.msk.f32.mxu0 %vm2714_vm0, %v2715_v7  ;;  %s3625_s2 = sld [smem:[#allocation10_spill]] }
   0x9   :  { %2636 = vset.pattern.permute.xlu1 %v2716_v8  ;;  %2635 = vset.pattern.permute.xlu0 %v2716_v8 }
   0xa   :  { %2601 = vmatprep.subr.bf16.mxu1 %v2713_v4  ;;  %2436 = vmatprep.mubr.msk.f32.mxu1 %vm2714_vm0, %v2715_v7 }
   0xd   :  { %v72_v1 = vld [vmem:[%s3623_s3] sm:$0xff]  ;;  %v73_v2 = vld [vmem:[%s3623_s3 + $0x8] sm:$0xff]  ;;  %v74_v3 = vld [vmem:[%s3623_s3 + $0x10] sm:$0xff] }
   0xe   :  { %v2596_v5 = vpack.c.bf16 %v73_v2, %v72_v1  ;;  %v75_v6 = vld [vmem:[%s3623_s3 + $0x18] sm:$0xff]  ;;  %v187_v9 = vld [vmem:[%s3624_s23] sm:$0xff]  ;;  %v188_v12 = vld [vmem:[%s3624_s23 + $0x8] sm:$0xff] }
   0xf   :  { %v79_v10 = vld [vmem:[%s3625_s2] sm:$0xff]  ;;  %v2599_v11 = vpack.c.bf16 %v75_v6, %v74_v3  ;;  %192 = vperm.xlu1 %2636, %v187_v9   ;;  %v80_v13 = vld [vmem:[%s3625_s2 + $0x8] sm:$0xff] }
  0x10   :  { %2597 = vmatpush3.bf16.msra.mxu0 %v2596_v5  ;;  %84 = vperm.xlu0 %2635, %v79_v10  }
  0x11   :  { %2598 = vmatprep.subr.bf16.mxu0 %v2713_v4 }
  0x12   :  { %28 = vsyncpa [#allocation4], 0  ;;  %s3626_s0 = sld [smem:[#allocation9_spill]]  ;;  %vm97_vm1 = vcmask 261120   ;;  %v189_v15 = vld [vmem:[%s3624_s23 + $0x10] sm:$0xff]  ;;  %v205_v19 = vlaneseq  ;;  %s3627_s26 = sld [smem:[#allocation6_spill]] }
  0x13   :  { %197 = vperm.xlu1 %2636, %v188_v12   ;;  %v81_v16 = vld [vmem:[%s3625_s2 + $0x10] sm:$0xff]  ;;  %s2717_s27 = smov 8   ;;  %v254_v51 = vld [vmem:[%s3596_s6 + $0x20] sm:$0xff]  ;;  %v253_v54 = vld [vmem:[%s3596_s6 + $0x18] sm:$0xff]  ;;  %vm237_vm2 = vcmask 64512   ;;  %s3628_s30 = sld [smem:[#allocation11_spill]] }
  0x14   :  { %2600 = vmatpush3.bf16.msra.mxu0 %v2599_v11  ;;  %89 = vperm.xlu0 %2635, %v80_v13   ;;  %v2886_v20 = vshrl.u32 %v205_v19, 7  ;;  %v255_v55 = vld [vmem:[%s3596_s6 + $0x28] sm:$0xff]  ;;  %v256_v56 = vld [vmem:[%s3596_s6 + $0x30] sm:$0xff]  ;;  %v257_v57 = vld [vmem:[%s3596_s6 + $0x38] sm:$0xff]  ;;  %vm304_vm3 = vcmask 195584   ;;  %vm574_vm4 = vcmask 130112  }
  0x15   :  { %2604 = vmatprep.subr.bf16.mxu0 %v2713_v4  ;;  %v251_v58 = vld [vmem:[%s3596_s6 + $0x8] sm:$0xff]  ;;  %v258_v59 = vld [vmem:[%s3596_s6 + $0x40] sm:$0xff]  ;;  %v252_v61 = vld [vmem:[%s3596_s6 + $0x10] sm:$0xff]  ;;  %vm576_vm5 = vcmask 126016   ;;  %s2718_s22 = smov 120   ;;  %vm505_vm6 = vcmask 1043456  }
  0x16   :  { %v207_v21 = vsub.s32 0, %v2886_v20  ;;  %v217_v22 = vsub.s32 1, %v2886_v20  ;;  %v250_v60 = vld [vmem:[%s3596_s6] sm:$0xff]  ;;  %vm445_vm7 = vcmask 60416   ;;  %vm805_vm8 = vcmask 130048  }
  0x17   :  { %202 = vperm.xlu1 %2636, %v189_v15   ;;  %vm2214_vm9 = vcmask 128000   ;;  %vm2233_vm10 = vcmask 57344  }
  0x18   :  { %v76_v14 = vld [vmem:[%s3626_s0] sm:$0xff]  ;;  %v77_v17 = vld [vmem:[%s3626_s0 + $0x8] sm:$0xff]  ;;  %94 = vperm.xlu0 %2635, %v81_v16   ;;  %v78_v18 = vld [vmem:[%s3626_s0 + $0x10] sm:$0xff] }
  0x19   :  { %2422 = vmatmul.mubr.msk.f32.vlgmr.msra.gmra.mrb[0].mxu0 %vm97_vm1, %v76_v14  ;;  %v71_v23 = vld [vmem:[%s3627_s26] sm:$0x3]  ;;  %v242_v8 = vld [vmem:[%s3628_s30 + $0x8] sm:$0xff]  ;;  %v243_v9 = vld [vmem:[%s3628_s30 + $0x10] sm:$0xff] }
  0x1a   :  { %2424 = vmatprep.mubr.msk.f32.mxu0 %vm2714_vm0, %v2715_v7  ;;  %v208_v25 = vrot.slane %v71_v23, %v207_v21  ;;  %v218_v26 = vrot.slane %v71_v23, %v217_v22  ;;  %v241_v5 = vld [vmem:[%s3628_s30] sm:$0xff]  ;;  %v244_v10 = vld [vmem:[%s3628_s30 + $0x18] sm:$0xff]  ;;  %v246_v12 = vld [vmem:[%s3628_s30 + $0x28] sm:$0xff] }
  0x1b   :  { %v245_v11 = vld [vmem:[%s3628_s30 + $0x20] sm:$0xff]  ;;  %v247_v13 = vld [vmem:[%s3628_s30 + $0x30] sm:$0xff]  ;;  %v248_v14 = vld [vmem:[%s3628_s30 + $0x38] sm:$0xff] }
  0x1c   :  { %v249_v15 = vld [vmem:[%s3628_s30 + $0x40] sm:$0xff] }
  0x1d   :  { %2425 = vmatmul.mubr.msk.f32.gmra.mrb[2].mxu0 %vm97_vm1, %v77_v17 }
  0x1e   :  { %2427 = vmatprep.mubr.msk.f32.mxu0 %vm2714_vm0, %v2715_v7 }
  0x21   :  { %2428 = vmatmul.mubr.msk.f32.gmra.mrb[4].mxu0 %vm97_vm1, %v78_v18 }
  0x22   :  { %2469 = vmatprep.mubr.msk.f32.mxu0 %vm2714_vm0, %v2715_v7 }
  0x8e   :  { %v193_v24 = vpop.permute.xlu1 %192 }
  0x8f   :  { %v85_v27 = vpop.permute.xlu0 %84  ;;  %v209_v28 = vmul.f32 %v208_v25, %v193_v24  ;;  %v219_v29 = vmul.f32 %v218_v26, %v193_v24 }
  0x92   :  { %v198_v30 = vpop.permute.xlu1 %197 }
  0x93   :  { %v90_v34 = vpop.permute.xlu0 %89  ;;  %v210_v38 = vmul.f32 %v208_v25, %v198_v30  ;;  %v220_v39 = vmul.f32 %v218_v26, %v198_v30 }
  0x96   :  { %v203_v42 = vpop.permute.xlu1 %202 }
  0x97   :  { %v95_v45 = vpop.permute.xlu0 %94  ;;  %v211_v47 = vmul.f32 %v208_v25, %v203_v42  ;;  %v221_v48 = vmul.f32 %v218_v26, %v203_v42 }
  0xec   :  { %v173_v31 = vpop.f32.mrb[0].mxu0 }
  0xed   :  { %v174_v32 = vadd.f32 %v173_v31, %v85_v27  ;;  %v2423_v33 = vpop.f32.mrb[1].mxu0 }
  0xef   :  { %v212_v35 = vadd.f32 %v209_v28, %v174_v32  ;;  %v222_v36 = vadd.f32 %v219_v29, %v174_v32 }
  0xf0   :  { %v178_v37 = vpop.f32.mrb[2].mxu0 }
  0xf1   :  { %v179_v40 = vadd.f32 %v178_v37, %v90_v34  ;;  %v2426_v41 = vpop.f32.mrb[3].mxu0  ;;  %228 = vrot.lane.b32.xlu0 %v222_v36, %s2717_s27 }
  0xf3   :  { %v213_v43 = vadd.f32 %v210_v38, %v179_v40  ;;  %v223_v44 = vadd.f32 %v220_v39, %v179_v40 }
  0xf4   :  { %v183_v46 = vpop.f32.mrb[4].mxu0 }
  0xf5   :  { %v184_v49 = vadd.f32 %v183_v46, %v95_v45  ;;  %230 = vrot.lane.b32.xlu1 %v223_v44, %s2717_s27  ;;  %v2429_v50 = vpop.f32.mrb[5].mxu0 }
  0xf7   :  { %v214_v52 = vadd.f32 %v211_v47, %v184_v49  ;;  %v224_v53 = vadd.f32 %v221_v48, %v184_v49 }
  0xf9   :  { %281 = vperm.xlu1 %2636, %v254_v51   ;;  %232 = vrot.lane.b32.xlu0 %v224_v53, %s2717_s27 }
  0xfd   :  { %276 = vperm.xlu1 %2636, %v253_v54   ;;  %286 = vperm.xlu0 %2635, %v255_v55  }
 0x101   :  { %291 = vperm.xlu1 %2636, %v256_v56   ;;  %296 = vperm.xlu0 %2635, %v257_v57  }
 0x105   :  { %266 = vperm.xlu1 %2636, %v251_v58   ;;  %301 = vperm.xlu0 %2635, %v258_v59  }
 0x109   :  { %261 = vperm.xlu1 %2636, %v250_v60   ;;  %271 = vperm.xlu0 %2635, %v252_v61  }
 0x163   :  { %v229_v62 = vpop.permute.xlu0 %228 }
 0x164   :  { %v2926_v0 = vsel %vm237_vm2, %v212_v35, %v229_v62 }
 0x167   :  { %v231_v63 = vpop.permute.xlu1 %230 }
 0x168   :  { %v2929_v1 = vsel %vm237_vm2, %v213_v43, %v231_v63 }
 0x169   :  { %v2602_v2 = vpack.c.bf16 %v2929_v1, %v2926_v0 }
 0x16b   :  { %v233_v3 = vpop.permute.xlu0 %232  ;;  %2603 = vmatpush3.bf16.msra.mxu1 %v2602_v2 }
 0x16c   :  { %2434 = vmatprep.subr.mxu1 %v2715_v7  ;;  %v2938_v6 = vsel %vm237_vm2, %v214_v52, %v233_v3 }
 0x16f   :  { %2435 = vmatpush3.msra.mxu1 %v2938_v6 }
 0x170   :  { %2437 = vmatmul.mubr.msk.f32.vlgmr.msra.gmra.mrb[0].mxu1 %vm304_vm3, %v241_v5  ;;  %2610 = vmatprep.subr.bf16.mxu1 %v2713_v4 }
 0x171   :  { %2439 = vmatprep.mubr.msk.f32.mxu1 %vm2714_vm0, %v2715_v7 }
 0x174   :  { %2440 = vmatmul.mubr.msk.f32.gmra.mrb[2].mxu1 %vm304_vm3, %v242_v8 }
 0x175   :  { %2442 = vmatprep.mubr.msk.f32.mxu1 %vm2714_vm0, %v2715_v7 }
 0x178   :  { %2443 = vmatmul.mubr.msk.f32.gmra.mrb[4].mxu1 %vm304_vm3, %v243_v9  ;;  %v282_v16 = vpop.permute.xlu1 %281 }
 0x179   :  { %2445 = vmatprep.mubr.msk.f32.mxu1 %vm2714_vm0, %v2715_v7 }
 0x17c   :  { %2446 = vmatmul.mubr.msk.f32.gmra.mrb[6].mxu1 %vm304_vm3, %v244_v10  ;;  %v277_v17 = vpop.permute.xlu1 %276  ;;  %v287_v19 = vpop.permute.xlu0 %286 }
 0x17d   :  { %2448 = vmatprep.mubr.msk.f32.mxu1 %vm2714_vm0, %v2715_v7 }
 0x180   :  { %2449 = vmatmul.mubr.msk.f32.gmra.mrb[8].mxu1 %vm304_vm3, %v245_v11  ;;  %v292_v23 = vpop.permute.xlu1 %291  ;;  %v297_v26 = vpop.permute.xlu0 %296 }
 0x181   :  { %2451 = vmatprep.mubr.msk.f32.mxu1 %vm2714_vm0, %v2715_v7 }
 0x184   :  { %2452 = vmatmul.mubr.msk.f32.gmra.mrb[10].mxu1 %vm304_vm3, %v246_v12  ;;  %v267_v27 = vpop.permute.xlu1 %266  ;;  %v302_v33 = vpop.permute.xlu0 %301 }
 0x185   :  { %2454 = vmatprep.mubr.msk.f32.mxu1 %vm2714_vm0, %v2715_v7 }
 0x188   :  { %2455 = vmatmul.mubr.msk.f32.gmra.mrb[12].mxu1 %vm304_vm3, %v247_v13  ;;  %v262_v34 = vpop.permute.xlu1 %261  ;;  %v272_v42 = vpop.permute.xlu0 %271 }
 0x189   :  { %2457 = vmatprep.mubr.msk.f32.mxu1 %vm2714_vm0, %v2715_v7 }
 0x18c   :  { %2458 = vmatmul.mubr.msk.f32.gmra.mrb[14].mxu1 %vm304_vm3, %v248_v14 }
 0x18d   :  { %2460 = vmatprep.mubr.msk.f32.mxu1 %vm2714_vm0, %v2715_v7 }
 0x190   :  { %2461 = vmatmul.mubr.msk.f32.gmra.mrb[16].mxu1 %vm304_vm3, %v249_v15 }
 0x191   :  { %2499 = vmatprep.mubr.msk.f32.mxu1 %vm2714_vm0, %v2715_v7 }
 0x243   :  { %v398_v18 = vpop.f32.mrb[0].mxu1 }
 0x244   :  { %v2438_v22 = vpop.f32.mrb[1].mxu1  ;;  %v2995_v35 = vadd.f32 %v398_v18, %v262_v34 }
 0x247   :  { %v403_v24 = vpop.f32.mrb[2].mxu1 }
 0x248   :  { %v2441_v25 = vpop.f32.mrb[3].mxu1  ;;  %v2997_v37 = vadd.f32 %v403_v24, %v267_v27 }
 0x24b   :  { %v408_v28 = vpop.f32.mrb[4].mxu1 }
 0x24c   :  { %v2444_v29 = vpop.f32.mrb[5].mxu1  ;;  %v3007_v44 = vadd.f32 %v408_v28, %v272_v42 }
 0x24f   :  { %v413_v30 = vpop.f32.mrb[6].mxu1 }
 0x250   :  { %v2993_v31 = vadd.f32 %v413_v30, %v277_v17  ;;  %v2447_v32 = vpop.f32.mrb[7].mxu1 }
 0x252   :  { %v442_v38 = vmul.f32 %v2993_v31, %v2995_v35 }
 0x253   :  { %v418_v36 = vpop.f32.mrb[8].mxu1 }
 0x254   :  { %v3001_v39 = vadd.f32 %v418_v36, %v282_v16  ;;  %v2450_v40 = vpop.f32.mrb[9].mxu1  ;;  %v586_v45 = vsel %vm574_vm4, %v442_v38, 0.0  ;;  %v444_v8 = vsel %vm237_vm2, %v442_v38, 0.0 }
 0x256   :  { %v443_v41 = vmul.f32 %v3001_v39, %v2997_v37  ;;  %459 = vrot.lane.b32.xlu0 %v3001_v39, %s2718_s22 }
 0x257   :  { %v423_v43 = vpop.f32.mrb[10].mxu1 }
 0x258   :  { %v587_v46 = vsel %vm576_vm5, %v443_v41, 0.0  ;;  %v3011_v47 = vadd.f32 %v423_v43, %v287_v19  ;;  %v2453_v48 = vpop.f32.mrb[11].mxu1  ;;  %v506_v52 = vrot.slane %v443_v41, 4  ;;  %v446_v5 = vsel %vm445_vm7, %v443_v41, 0.0 }
 0x259   :  { %v3013_v49 = vadd.f32 %v587_v46, %v586_v45  ;;  %v447_v9 = vadd.f32 %v446_v5, %v444_v8 }
 0x25a   :  { %v502_v50 = vmul.f32 %v3011_v47, %v3007_v44  ;;  %457 = vrot.lane.b32.xlu0 %v2993_v31, %s2718_s22  ;;  %522 = vrot.lane.b32.xlu1 %v3011_v47, %s2718_s22 }
 0x25b   :  { %v428_v51 = vpop.f32.mrb[12].mxu1  ;;  %v448_v13 = vrot.slane %v447_v9, 4 }
 0x25c   :  { %v507_v53 = vrot.slane %v502_v50, 4  ;;  %v3021_v54 = vadd.f32 %v428_v51, %v292_v23  ;;  %v2456_v55 = vpop.f32.mrb[13].mxu1 }
 0x25d   :  { %v449_v16 = vadd.f32 %v448_v13, %v447_v9 }
 0x25e   :  { %v508_v56 = vsel %vm505_vm6, %v506_v52, %v507_v53  ;;  %v635_v57 = vsel %vm576_vm5, %v507_v53, 0.0  ;;  %482 = vrot.lane.b32.xlu0 %v3021_v54, %s2718_s22  ;;  %v512_v11 = vsel %vm445_vm7, %v507_v53, 0.0 }
 0x25f   :  { %v634_v58 = vsel %vm574_vm4, %v508_v56, 0.0  ;;  %v433_v59 = vpop.f32.mrb[14].mxu1  ;;  %v511_v10 = vsel %vm237_vm2, %v508_v56, 0.0  ;;  %v450_v25 = vrot.slane %v449_v16, 2 }
 0x260   :  { %v3028_v60 = vadd.f32 %v635_v57, %v634_v58  ;;  %v3030_v61 = vadd.f32 %v433_v59, %v297_v26  ;;  %v2459_v62 = vpop.f32.mrb[15].mxu1  ;;  %v513_v12 = vadd.f32 %v512_v11, %v511_v10 }
 0x261   :  { %v451_v36 = vadd.f32 %v450_v25, %v449_v16 }
 0x262   :  { %484 = vrot.lane.b32.xlu1 %v3030_v61, %s2718_s22  ;;  %v514_v15 = vrot.slane %v513_v12, 4 }
 0x263   :  { %v438_v63 = vpop.f32.mrb[16].mxu1  ;;  %v452_v46 = vrot.slane %v451_v36, 1 }
 0x264   :  { %v3034_v2 = vadd.f32 %v438_v63, %v302_v33  ;;  %v2462_v3 = vpop.f32.mrb[17].mxu1  ;;  %v515_v22 = vadd.f32 %v514_v15, %v513_v12 }
 0x265   :  { %v453_v55 = vadd.f32 %v452_v46, %v451_v36 }
 0x266   :  { %549 = vrot.lane.b32.xlu1 %v3034_v2, %s2718_s22  ;;  %v516_v32 = vrot.slane %v515_v22, 2 }
 0x267   :  { %v454_v63 = vmul.f32 0.28867513, %v453_v55 }
 0x268   :  { %v517_v43 = vadd.f32 %v516_v32, %v515_v22 }
 0x26a   :  { %v518_v52 = vrot.slane %v517_v43, 1 }
 0x26c   :  { %v519_v59 = vadd.f32 %v518_v52, %v517_v43  ;;  %v589_v43 = vrot.slane %v3013_v49, 4 }
 0x26e   :  { %v520_v9 = vmul.f32 0.28867513, %v519_v59  ;;  %v590_v55 = vadd.f32 %v589_v43, %v3013_v49 }
 0x2c8   :  { %v460_v14 = vpop.permute.xlu0 %459 }
 0x2c9   :  { %v464_v17 = vmul.f32 %v460_v14, %v2997_v37 }
 0x2cb   :  { %v466_v26 = vsel %vm445_vm7, %v464_v17, 0.0  ;;  %v528_v27 = vrot.slane %v464_v17, 4 }
 0x2cc   :  { %v458_v18 = vpop.permute.xlu0 %457  ;;  %v523_v19 = vpop.permute.xlu1 %522 }
 0x2cd   :  { %v463_v23 = vmul.f32 %v458_v18, %v2995_v35  ;;  %v525_v24 = vmul.f32 %v523_v19, %v3007_v44 }
 0x2cf   :  { %v465_v28 = vsel %vm237_vm2, %v463_v23, 0.0  ;;  %v529_v29 = vrot.slane %v525_v24, 4 }
 0x2d0   :  { %v467_v30 = vadd.f32 %v466_v26, %v465_v28  ;;  %v483_v23 = vpop.permute.xlu0 %482 }
 0x2d1   :  { %v530_v33 = vsel %vm505_vm6, %v528_v27, %v529_v29  ;;  %v534_v34 = vsel %vm445_vm7, %v529_v29, 0.0  ;;  %v488_v26 = vsub.f32 %v3021_v54, %v483_v23 }
 0x2d2   :  { %v468_v38 = vrot.slane %v467_v30, 4  ;;  %v533_v40 = vsel %vm237_vm2, %v530_v33, 0.0 }
 0x2d3   :  { %v535_v41 = vadd.f32 %v534_v34, %v533_v40 }
 0x2d4   :  { %v469_v42 = vadd.f32 %v468_v38, %v467_v30  ;;  %v485_v18 = vpop.permute.xlu1 %484 }
 0x2d5   :  { %v536_v45 = vrot.slane %v535_v41, 4  ;;  %v489_v19 = vsub.f32 %v3030_v61, %v485_v18 }
 0x2d6   :  { %v470_v48 = vrot.slane %v469_v42, 2 }
 0x2d7   :  { %v537_v50 = vadd.f32 %v536_v45, %v535_v41  ;;  %v650_v34 = vrot.slane %v489_v19, 4 }
 0x2d8   :  { %v471_v51 = vadd.f32 %v470_v48, %v469_v42  ;;  %v550_v29 = vpop.permute.xlu1 %549 }
 0x2d9   :  { %v538_v53 = vrot.slane %v537_v50, 2  ;;  %v552_v30 = vsub.f32 %v3034_v2, %v550_v29  ;;  %v802_v29 = vld [vmem:[%s3600_s10] sm:$0xff] }
 0x2da   :  { %v472_v56 = vrot.slane %v471_v51, 1 }
 0x2db   :  { %v539_v57 = vadd.f32 %v538_v53, %v537_v50  ;;  %v651_v33 = vrot.slane %v552_v30, 4 }
 0x2dc   :  { %v473_v58 = vadd.f32 %v472_v56, %v471_v51 }
 0x2dd   :  { %v540_v62 = vrot.slane %v539_v57, 1  ;;  %v652_v36 = vsel %vm505_vm6, %v650_v34, %v651_v33 }
 0x2de   :  { %v474_v3 = vmul.f32 0.28867513, %v473_v58 }
 0x2df   :  { %v541_v5 = vadd.f32 %v540_v62, %v539_v57  ;;  %v689_v57 = vld [vmem:[%s3598_s8] sm:$0xff] }
 0x2e0   :  { %v475_v8 = vsub.f32 %v474_v3, %v454_v63 }
 0x2e1   :  { %v542_v10 = vmul.f32 0.28867513, %v541_v5  ;;  %v591_v5 = vrot.slane %v590_v55, 2 }
 0x2e2   :  { %v476_v11 = vmul.f32 1.442695, %v475_v8  ;;  %v691_v8 = vld [vmem:[%s3598_s8 + $0x10] sm:$0xff] }
 0x2e3   :  { %v543_v12 = vsub.f32 %v542_v10, %v520_v9 }
 0x2e4   :  { %2647 = vpow2.f32 %v476_v11 }
 0x2e5   :  { %v544_v13 = vmul.f32 1.442695, %v543_v12  ;;  %v690_v12 = vld [vmem:[%s3598_s8 + $0x8] sm:$0xff] }
 0x2e7   :  { %2649 = vpow2.f32 %v544_v13 }
 0x2ee   :  { %v2648_v14 = vpop.eup %2647 }
 0x2ef   :  { %v478_v15 = vadd.f32 1.0, %v2648_v14 }
 0x2f1   :  { %v2650_v16 = vpop.eup %2649  ;;  %2651 = vrcp.f32 %v478_v15  ;;  %v592_v15 = vadd.f32 %v591_v5, %v590_v55  ;;  %v883_v55 = vld [vmem:[%s3604_s14 + $0x10] sm:$0xff] }
 0x2f2   :  { %v546_v17 = vadd.f32 1.0, %v2650_v16  ;;  %v1109_v5 = vld [vmem:[%s3602_s12 + $0x10] sm:$0xff] }
 0x2f4   :  { %2653 = vrcp.f32 %v546_v17  ;;  %v800_v17 = vld [vmem:[%s3599_s9 + $0x8] sm:$0xff] }
 0x2fb   :  { %v2652_v22 = vpop.eup %2651 }
 0x2fc   :  { %v491_v24 = vmul.f32 %v2652_v22, %v489_v19  ;;  %v490_v28 = vmul.f32 %v2652_v22, %v488_v26 }
 0x2fe   :  { %v2654_v25 = vpop.eup %2653  ;;  %496 = vrot.lane.b32.xlu0 %v491_v24, %s2717_s27 }
 0x2ff   :  { %v553_v27 = vmul.f32 %v2654_v25, %v489_v19  ;;  %v554_v32 = vmul.f32 %v2654_v25, %v552_v30  ;;  %v593_v25 = vrot.slane %v592_v15, 1 }
 0x301   :  { %557 = vrot.lane.b32.xlu1 %v553_v27, %s2717_s27  ;;  %v803_v27 = vld [vmem:[%s3600_s10 + $0x8] sm:$0xff]  ;;  %v594_v34 = vadd.f32 %v593_v25, %v592_v15  ;;  %v2287_v15 = vld [vmem:[%s3596_s6 + $0x60] sm:$0xff]  ;;  %v2286_v25 = vld [vmem:[%s3596_s6 + $0x58] sm:$0xff] }
 0x302   :  { %494 = vrot.lane.b32.xlu0 %v490_v28, %s2717_s27 }
 0x305   :  { %568 = vrot.lane.b32.xlu1 %v3001_v39, %s2717_s27 }
 0x306   :  { %613 = vrot.lane.b32.xlu0 %v3011_v47, %s2717_s27 }
 0x309   :  { %559 = vrot.lane.b32.xlu1 %v554_v32, %s2717_s27 }
 0x30a   :  { %566 = vrot.lane.b32.xlu0 %v2993_v31, %s2717_s27  ;;  %v637_v31 = vrot.slane %v3028_v60, 4 }
 0x30c   :  { %v638_v52 = vadd.f32 %v637_v31, %v3028_v60 }
 0x30d   :  { %653 = vrot.lane.b32.xlu1 %v652_v36, %s2717_s27 }
 0x30e   :  { %605 = vrot.lane.b32.xlu0 %v489_v19, %s2717_s27  ;;  %v799_v19 = vld [vmem:[%s3599_s9] sm:$0xff] }
 0x311   :  { %603 = vrot.lane.b32.xlu1 %v488_v26, %s2717_s27 }
 0x312   :  { %655 = vrot.lane.b32.xlu0 %v651_v33, %s2717_s27 }
 0x370   :  { %v497_v39 = vpop.permute.xlu0 %496 }
 0x371   :  { %v501_v38 = vadd.f32 %v497_v39, %v3030_v61  ;;  %v804_v39 = vld [vmem:[%s3600_s10 + $0x10] sm:$0xff] }
 0x373   :  { %v558_v47 = vpop.permute.xlu1 %557 }
 0x374   :  { %v563_v40 = vadd.f32 %v558_v47, %v3030_v61  ;;  %v495_v41 = vpop.permute.xlu0 %494 }
 0x375   :  { %v500_v42 = vadd.f32 %v495_v41, %v3021_v54 }
 0x376   :  { %v565_v45 = vsel %vm505_vm6, %v501_v38, %v563_v40  ;;  %v801_v38 = vld [vmem:[%s3599_s9 + $0x10] sm:$0xff] }
 0x377   :  { %v2637_v46 = vpack.i.bf16 %v565_v45, %v500_v42  ;;  %v569_v48 = vpop.permute.xlu1 %568  ;;  %v595_v42 = vmul.f32 0.28867513, %v594_v34  ;;  %v882_v45 = vld [vmem:[%s3604_s14 + $0x8] sm:$0xff] }
 0x378   :  { %v573_v50 = vmul.f32 %v569_v48, %v2997_v37  ;;  %v614_v51 = vpop.permute.xlu0 %613  ;;  %v639_v37 = vrot.slane %v638_v52, 2  ;;  %v881_v48 = vld [vmem:[%s3604_s14] sm:$0xff] }
 0x379   :  { %v616_v53 = vmul.f32 %v614_v51, %v3007_v44  ;;  %2638 = vrot.lane.b32.xlu1 %v2637_v46, %s2718_s22 }
 0x37a   :  { %v619_v56 = vrot.slane %v573_v50, 4  ;;  %v577_v9 = vsel %vm576_vm5, %v573_v50, 0.0  ;;  %v640_v13 = vadd.f32 %v639_v37, %v638_v52 }
 0x37b   :  { %v620_v58 = vrot.slane %v616_v53, 4  ;;  %v560_v59 = vpop.permute.xlu1 %559  ;;  %v994_v53 = vld [vmem:[%s3606_s16] sm:$0xff] }
 0x37c   :  { %v564_v62 = vadd.f32 %v560_v59, %v3034_v2  ;;  %v567_v63 = vpop.permute.xlu0 %566  ;;  %v641_v23 = vrot.slane %v640_v13, 1  ;;  %v1104_v59 = vld [vmem:[%s3601_s11] sm:$0xff] }
 0x37d   :  { %v621_v3 = vsel %vm505_vm6, %v619_v56, %v620_v58  ;;  %v625_v60 = vsel %vm576_vm5, %v620_v58, 0.0  ;;  %v572_v44 = vmul.f32 %v567_v63, %v2995_v35  ;;  %694 = vperm.xlu1 %2636, %v689_v57   ;;  %v996_v56 = vld [vmem:[%s3606_s16 + $0x10] sm:$0xff]  ;;  %v995_v57 = vld [vmem:[%s3606_s16 + $0x8] sm:$0xff] }
 0x37e   :  { %v624_v49 = vsel %vm574_vm4, %v621_v3, 0.0  ;;  %678 = vrot.lane.b32.xlu0 %v564_v62, %s2718_s22  ;;  %v642_v32 = vadd.f32 %v641_v23, %v640_v13  ;;  %v1105_v58 = vld [vmem:[%s3601_s11 + $0x8] sm:$0xff]  ;;  %v2290_v23 = vld [vmem:[%s3596_s6 + $0x78] sm:$0xff] }
 0x37f   :  { %v626_v10 = vadd.f32 %v625_v60, %v624_v49  ;;  %v575_v11 = vsel %vm574_vm4, %v572_v44, 0.0  ;;  %v1108_v3 = vld [vmem:[%s3602_s12 + $0x8] sm:$0xff]  ;;  %v1107_v44 = vld [vmem:[%s3602_s12] sm:$0xff]  ;;  %v1106_v49 = vld [vmem:[%s3601_s11 + $0x10] sm:$0xff] }
 0x380   :  { %v578_v35 = vadd.f32 %v577_v9, %v575_v11  ;;  %v643_v41 = vmul.f32 0.28867513, %v642_v32  ;;  %v2288_v9 = vld [vmem:[%s3596_s6 + $0x68] sm:$0xff]  ;;  %v654_v11 = vpop.permute.xlu1 %653 }
 0x381   :  { %v627_v14 = vrot.slane %v626_v10, 4  ;;  %704 = vperm.xlu1 %2636, %v691_v8   ;;  %v2289_v8 = vld [vmem:[%s3596_s6 + $0x70] sm:$0xff] }
 0x382   :  { %v579_v16 = vrot.slane %v578_v35, 4  ;;  %699 = vperm.xlu0 %2635, %v690_v12   ;;  %v2291_v12 = vld [vmem:[%s3596_s6 + $0x80] sm:$0xff] }
 0x383   :  { %v628_v18 = vadd.f32 %v627_v14, %v626_v10  ;;  %v606_v14 = vpop.permute.xlu0 %605 }
 0x384   :  { %v580_v22 = vadd.f32 %v579_v16, %v578_v35 }
 0x385   :  { %v629_v24 = vrot.slane %v628_v18, 2  ;;  %849 = vperm.xlu1 %2636, %v800_v17  }
 0x386   :  { %v581_v26 = vrot.slane %v580_v22, 2  ;;  %844 = vperm.xlu0 %2635, %v799_v19   ;;  %v2292_v19 = vld [vmem:[%s3596_s6 + $0x88] sm:$0xff] }
 0x387   :  { %v630_v28 = vadd.f32 %v629_v24, %v628_v18 }
 0x388   :  { %v582_v30 = vadd.f32 %v581_v26, %v580_v22  ;;  %v2285_v26 = vld [vmem:[%s3596_s6 + $0x50] sm:$0xff] }
 0x389   :  { %v631_v33 = vrot.slane %v630_v28, 1  ;;  %867 = vperm.xlu1 %2636, %v803_v27   ;;  %v656_v27 = vpop.permute.xlu0 %655 }
 0x38a   :  { %v583_v36 = vrot.slane %v582_v30, 1  ;;  %862 = vperm.xlu0 %2635, %v802_v29  }
 0x38b   :  { %v632_v47 = vadd.f32 %v631_v33, %v630_v28  ;;  %v604_v28 = vpop.permute.xlu1 %603 }
 0x38c   :  { %v584_v40 = vadd.f32 %v583_v36, %v582_v30 }
 0x38d   :  { %v633_v31 = vmul.f32 0.28867513, %v632_v47  ;;  %872 = vperm.xlu1 %2636, %v804_v39  }
 0x38e   :  { %v585_v43 = vmul.f32 0.28867513, %v584_v40  ;;  %854 = vperm.xlu0 %2635, %v801_v38  }
 0x38f   :  { %v644_v46 = vsub.f32 %v643_v41, %v633_v31 }
 0x390   :  { %v596_v50 = vsub.f32 %v595_v42, %v585_v43  ;;  %v686_v43 = vld [vmem:[%s3597_s7] sm:$0xff] }
 0x391   :  { %v645_v51 = vmul.f32 1.442695, %v644_v46  ;;  %891 = vperm.xlu1 %2636, %v882_v45   ;;  %v688_v45 = vld [vmem:[%s3597_s7 + $0x10] sm:$0xff] }
 0x392   :  { %v597_v52 = vmul.f32 1.442695, %v596_v50  ;;  %886 = vperm.xlu0 %2635, %v881_v48  }
 0x393   :  { %2655 = vpow2.f32 %v645_v51 }
 0x394   :  { %2657 = vpow2.f32 %v597_v52 }
 0x395   :  { %999 = vperm.xlu1 %2636, %v994_v53  }
 0x396   :  { %896 = vperm.xlu0 %2635, %v883_v55  }
 0x399   :  { %1009 = vperm.xlu1 %2636, %v996_v56  }
 0x39a   :  { %1004 = vperm.xlu0 %2635, %v995_v57  }
 0x39d   :  { %v2656_v62 = vpop.eup %2655  ;;  %1152 = vperm.xlu1 %2636, %v1105_v58  }
 0x39e   :  { %v2658_v63 = vpop.eup %2657  ;;  %v647_v37 = vadd.f32 1.0, %v2656_v62  ;;  %1147 = vperm.xlu0 %2635, %v1104_v59  }
 0x39f   :  { %v599_v60 = vadd.f32 1.0, %v2658_v63 }
 0x3a0   :  { %2659 = vrcp.f32 %v647_v37 }
 0x3a1   :  { %2661 = vrcp.f32 %v599_v60  ;;  %1170 = vperm.xlu1 %2636, %v1108_v3  }
 0x3a2   :  { %1165 = vperm.xlu0 %2635, %v1107_v44  }
 0x3a5   :  { %1175 = vperm.xlu1 %2636, %v1109_v5  }
 0x3a6   :  { %1157 = vperm.xlu0 %2635, %v1106_v49  }
 0x3a9   :  { %1228 = vperm.xlu1 %2636, %v2289_v8  }
 0x3aa   :  { %v2660_v10 = vpop.eup %2659  ;;  %1223 = vperm.xlu0 %2635, %v2288_v9  }
 0x3ab   :  { %v2662_v35 = vpop.eup %2661  ;;  %v659_v13 = vmul.f32 %v2660_v10, %v654_v11  ;;  %v660_v29 = vmul.f32 %v2660_v10, %v656_v27 }
 0x3ac   :  { %v610_v16 = vmul.f32 %v2662_v35, %v606_v14  ;;  %v609_v30 = vmul.f32 %v2662_v35, %v604_v28 }
 0x3ad   :  { %v663_v17 = vrot.slane %v659_v13, 4  ;;  %1238 = vperm.xlu1 %2636, %v2291_v12   ;;  %v664_v32 = vrot.slane %v660_v29, 4 }
 0x3ae   :  { %v612_v18 = vadd.f32 %v610_v16, %v3030_v61  ;;  %1218 = vperm.xlu0 %2635, %v2287_v15   ;;  %v611_v34 = vadd.f32 %v609_v30, %v3021_v54 }
 0x3af   :  { %v668_v22 = vadd.f32 %v663_v17, %v3030_v61  ;;  %v2284_v61 = vld [vmem:[%s3596_s6 + $0x48] sm:$0xff]  ;;  %v665_v40 = vsel %vm505_vm6, %v663_v17, %v664_v32 }
 0x3b0   :  { %v669_v42 = vadd.f32 %v665_v40, %v3034_v2  ;;  %v687_v2 = vld [vmem:[%s3597_s7 + $0x8] sm:$0xff] }
 0x3b1   :  { %v670_v24 = vsel %vm505_vm6, %v612_v18, %v668_v22  ;;  %1243 = vperm.xlu1 %2636, %v2292_v19  }
 0x3b2   :  { %1233 = vperm.xlu0 %2635, %v2290_v23  }
 0x3b5   :  { %1213 = vperm.xlu1 %2636, %v2286_v25  }
 0x3b6   :  { %1208 = vperm.xlu0 %2635, %v2285_v26  }
 0x3ba   :  { %1203 = vperm.xlu0 %2635, %v2284_v61  }
 0x3eb   :  { %v2639_v33 = vpop.permute.xlu1 %2638 }
 0x3ec   :  { %v2641_v36 = vunpack.i.h.bf16 %v2639_v33  ;;  %v2640_v39 = vunpack.i.l.bf16 %v2639_v33 }
 0x3ee   :  { %v684_v47 = vsel %vm237_vm2, %v2641_v36, %v670_v24  ;;  %v683_v38 = vsel %vm237_vm2, %v2640_v39, %v611_v34 }
 0x3ef   :  { %v2605_v41 = vpack.c.bf16 %v684_v47, %v683_v38 }
 0x3f0   :  { %v679_v31 = vpop.permute.xlu0 %678 }
 0x3f1   :  { %2606 = vmatpush3.bf16.msra.mxu0 %v2605_v41  ;;  %v685_v54 = vsel %vm237_vm2, %v679_v31, %v669_v42 }
 0x3f2   :  { %2467 = vmatprep.subr.mxu0 %v2715_v7 }
 0x3f5   :  { %2468 = vmatpush3.msra.mxu0 %v685_v54 }
 0x3f6   :  { %2470 = vmatmul.mubr.msk.f32.vlgmr.msra.gmra.mrb[6].mxu0 %vm304_vm3, %v686_v43  ;;  %2607 = vmatprep.subr.bf16.mxu0 %v2713_v4 }
 0x3f7   :  { %2472 = vmatprep.mubr.msk.f32.mxu0 %vm2714_vm0, %v2715_v7 }
 0x3fa   :  { %2473 = vmatmul.mubr.msk.f32.gmra.mrb[8].mxu0 %vm304_vm3, %v687_v2 }
 0x3fb   :  { %2475 = vmatprep.mubr.msk.f32.mxu0 %vm2714_vm0, %v2715_v7 }
 0x3fc   :  { %v695_v46 = vpop.permute.xlu1 %694 }
 0x3fe   :  { %2476 = vmatmul.mubr.msk.f32.gmra.mrb[10].mxu0 %vm304_vm3, %v688_v45 }
 0x3ff   :  { %2484 = vmatprep.mubr.msk.f32.mxu0 %vm2714_vm0, %v2715_v7 }
 0x400   :  { %v705_v59 = vpop.permute.xlu1 %704 }
 0x401   :  { %v700_v52 = vpop.permute.xlu0 %699 }
 0x404   :  { %v850_v34 = vpop.permute.xlu1 %849 }
 0x405   :  { %v845_v33 = vpop.permute.xlu0 %844 }
 0x408   :  { %v868_v42 = vpop.permute.xlu1 %867 }
 0x409   :  { %v863_v39 = vpop.permute.xlu0 %862 }
 0x40d   :  { %v855_v2 = vpop.permute.xlu0 %854 }
 0x4c9   :  { %v782_v48 = vpop.f32.mrb[6].mxu0 }
 0x4ca   :  { %v783_v50 = vadd.f32 %v782_v48, %v695_v46  ;;  %v2471_v51 = vpop.f32.mrb[7].mxu0  ;;  %v873_v48 = vpop.permute.xlu1 %872 }
 0x4cb   :  { %v878_v51 = vld [vmem:[%s3603_s13] sm:$0xff] }
 0x4cc   :  { %v796_v55 = vadd.f32 %v783_v50, %v2926_v0 }
 0x4cd   :  { %v787_v53 = vpop.f32.mrb[8].mxu0 }
 0x4ce   :  { %v788_v56 = vadd.f32 %v787_v53, %v700_v52  ;;  %v2474_v57 = vpop.f32.mrb[9].mxu0  ;;  %v806_v63 = vsel %vm805_vm8, %v796_v55, 0.0  ;;  %v879_v52 = vld [vmem:[%s3603_s13 + $0x8] sm:$0xff]  ;;  %v880_v53 = vld [vmem:[%s3603_s13 + $0x10] sm:$0xff] }
 0x4cf   :  { %v887_v57 = vpop.permute.xlu0 %886 }
 0x4d0   :  { %v797_v58 = vadd.f32 %v788_v56, %v2929_v1 }
 0x4d1   :  { %v792_v62 = vpop.f32.mrb[10].mxu0 }
 0x4d2   :  { %v807_v37 = vsel %vm805_vm8, %v797_v58, 0.0  ;;  %v793_v3 = vadd.f32 %v792_v62, %v705_v59  ;;  %v2477_v60 = vpop.f32.mrb[11].mxu0  ;;  %v892_v59 = vpop.permute.xlu1 %891 }
 0x4d3   :  { %v808_v44 = vadd.f32 %v807_v37, %v806_v63 }
 0x4d4   :  { %v798_v5 = vadd.f32 %v793_v3, %v2938_v6 }
 0x4d6   :  { %v809_v49 = vsel %vm805_vm8, %v798_v5, 0.0 }
 0x4d7   :  { %v810_v8 = vadd.f32 %v809_v49, %v808_v44  ;;  %v897_v44 = vpop.permute.xlu0 %896 }
 0x4d9   :  { %v811_v0 = vrot.slane %v810_v8, 4 }
 0x4db   :  { %v812_v9 = vadd.f32 %v811_v0, %v810_v8 }
 0x4dd   :  { %v813_v10 = vrot.slane %v812_v9, 2 }
 0x4df   :  { %v814_v11 = vadd.f32 %v813_v10, %v812_v9  ;;  %v991_v10 = vld [vmem:[%s3605_s15] sm:$0xff] }
 0x4e1   :  { %v815_v12 = vrot.slane %v814_v11, 1 }
 0x4e3   :  { %v816_v1 = vadd.f32 %v815_v12, %v814_v11  ;;  %v992_v11 = vld [vmem:[%s3605_s15 + $0x8] sm:$0xff]  ;;  %v993_v12 = vld [vmem:[%s3605_s15 + $0x10] sm:$0xff] }
 0x4e5   :  { %v818_v35 = vmul.f32 0.041666668, %v816_v1  ;;  %v1000_v1 = vpop.permute.xlu1 %999 }
 0x4e7   :  { %v819_v13 = vsub.f32 %v796_v55, %v818_v35  ;;  %v820_v14 = vsub.f32 %v797_v58, %v818_v35  ;;  %v821_v15 = vsub.f32 %v798_v5, %v818_v35 }
 0x4e9   :  { %v822_v16 = vmul.f32 %v819_v13, %v819_v13  ;;  %v823_v17 = vmul.f32 %v820_v14, %v820_v14  ;;  %v824_v18 = vmul.f32 %v821_v15, %v821_v15 }
 0x4eb   :  { %v825_v19 = vsel %vm805_vm8, %v822_v16, 0.0  ;;  %v826_v6 = vsel %vm805_vm8, %v823_v17, 0.0  ;;  %v828_v23 = vsel %vm805_vm8, %v824_v18, 0.0 }
 0x4ec   :  { %v827_v22 = vadd.f32 %v826_v6, %v825_v19 }
 0x4ee   :  { %v829_v24 = vadd.f32 %v828_v23, %v827_v22  ;;  %v1010_v22 = vpop.permute.xlu1 %1009 }
 0x4f0   :  { %v830_v25 = vrot.slane %v829_v24, 4 }
 0x4f2   :  { %v831_v26 = vadd.f32 %v830_v25, %v829_v24 }
 0x4f4   :  { %v832_v61 = vrot.slane %v831_v26, 2 }
 0x4f6   :  { %v833_v27 = vadd.f32 %v832_v61, %v831_v26 }
 0x4f8   :  { %v834_v28 = vrot.slane %v833_v27, 1 }
 0x4fa   :  { %v835_v29 = vadd.f32 %v834_v28, %v833_v27 }
 0x4fc   :  { %v836_v30 = vmul.f32 0.041666668, %v835_v29 }
 0x4fe   :  { %v837_v32 = vadd.f32 1e-05, %v836_v30 }
 0x500   :  { %2663 = vrsqrt.f32 %v837_v32 }
 0x50a   :  { %v2664_v36 = vpop.eup %2663 }
 0x50b   :  { %v841_v47 = vmul.f32 %v2664_v36, %v821_v15  ;;  %v839_v38 = vmul.f32 %v2664_v36, %v819_v13  ;;  %v840_v40 = vmul.f32 %v2664_v36, %v820_v14  ;;  %v1005_v15 = vpop.permute.xlu0 %1004 }
 0x50d   :  { %v857_v41 = vmul.f32 %v845_v33, %v839_v38  ;;  %v858_v31 = vmul.f32 %v850_v34, %v840_v40  ;;  %v859_v45 = vmul.f32 %v855_v2, %v841_v47 }
 0x50f   :  { %v875_v43 = vadd.f32 %v863_v39, %v857_v41  ;;  %v876_v54 = vadd.f32 %v868_v42, %v858_v31  ;;  %v877_v50 = vadd.f32 %v873_v48, %v859_v45 }
 0x511   :  { %v2608_v46 = vpack.c.bf16 %v876_v54, %v875_v43 }
 0x513   :  { %2609 = vmatpush3.bf16.msra.mxu0 %v2608_v46 }
 0x514   :  { %2482 = vmatprep.subr.mxu0 %v2715_v7 }
 0x517   :  { %2483 = vmatpush3.msra.mxu0 %v877_v50 }
 0x518   :  { %2485 = vmatmul.mubr.msk.f32.vlgmr.msra.gmra.mrb[12].mxu0 %vm304_vm3, %v878_v51  ;;  %2613 = vmatprep.subr.bf16.mxu0 %v2713_v4 }
 0x519   :  { %2487 = vmatprep.mubr.msk.f32.mxu0 %vm2714_vm0, %v2715_v7 }
 0x51c   :  { %2488 = vmatmul.mubr.msk.f32.gmra.mrb[14].mxu0 %vm304_vm3, %v879_v52 }
 0x51d   :  { %2490 = vmatprep.mubr.msk.f32.mxu0 %vm2714_vm0, %v2715_v7 }
 0x520   :  { %2491 = vmatmul.mubr.msk.f32.gmra.mrb[16].mxu0 %vm304_vm3, %v880_v53 }
 0x521   :  { %2514 = vmatprep.mubr.msk.f32.mxu0 %vm2714_vm0, %v2715_v7 }
 0x5eb   :  { %v974_v55 = vpop.f32.mrb[12].mxu0 }
 0x5ec   :  { %v2486_v56 = vpop.f32.mrb[13].mxu0  ;;  %v975_v58 = vadd.f32 %v974_v55, %v887_v57 }
 0x5ee   :  { %v988_v3 = vmax.f32 %v975_v58, 0.0 }
 0x5ef   :  { %v979_v62 = vpop.f32.mrb[14].mxu0 }
 0x5f0   :  { %v980_v63 = vadd.f32 %v979_v62, %v892_v59  ;;  %v2489_v37 = vpop.f32.mrb[15].mxu0  ;;  %v1148_v62 = vpop.permute.xlu0 %1147 }
 0x5f2   :  { %v989_v60 = vmax.f32 %v980_v63, 0.0  ;;  %v1153_v63 = vpop.permute.xlu1 %1152 }
 0x5f3   :  { %v984_v5 = vpop.f32.mrb[16].mxu0 }
 0x5f4   :  { %v2611_v49 = vpack.c.bf16 %v989_v60, %v988_v3  ;;  %v985_v8 = vadd.f32 %v984_v5, %v897_v44  ;;  %v2492_v0 = vpop.f32.mrb[17].mxu0  ;;  %v1166_v3 = vpop.permute.xlu0 %1165 }
 0x5f6   :  { %2612 = vmatpush3.bf16.msra.mxu1 %v2611_v49  ;;  %v990_v9 = vmax.f32 %v985_v8, 0.0  ;;  %v1171_v0 = vpop.permute.xlu1 %1170 }
 0x5f7   :  { %2497 = vmatprep.subr.mxu1 %v2715_v7 }
 0x5fa   :  { %2498 = vmatpush3.msra.mxu1 %v990_v9 }
 0x5fb   :  { %2500 = vmatmul.mubr.msk.f32.vlgmr.msra.gmra.mrb[18].mxu1 %vm304_vm3, %v991_v10  ;;  %2616 = vmatprep.subr.bf16.mxu1 %v2713_v4 }
 0x5fc   :  { %2502 = vmatprep.mubr.msk.f32.mxu1 %vm2714_vm0, %v2715_v7 }
 0x5ff   :  { %2503 = vmatmul.mubr.msk.f32.gmra.mrb[20].mxu1 %vm304_vm3, %v992_v11  ;;  %v1158_v11 = vpop.permute.xlu0 %1157 }
 0x600   :  { %2505 = vmatprep.mubr.msk.f32.mxu1 %vm2714_vm0, %v2715_v7 }
 0x603   :  { %2506 = vmatmul.mubr.msk.f32.gmra.mrb[22].mxu1 %vm304_vm3, %v993_v12 }
 0x604   :  { %2547 = vmatprep.mubr.msk.f32.mxu1 %vm2714_vm0, %v2715_v7 }
 0x6ce   :  { %v1087_v35 = vpop.f32.mrb[18].mxu1 }
 0x6cf   :  { %v1088_v13 = vadd.f32 %v1087_v35, %v1000_v1  ;;  %v2501_v14 = vpop.f32.mrb[19].mxu1  ;;  %v1176_v35 = vpop.permute.xlu1 %1175 }
 0x6d0   :  { %v2275_v14 = vld [vmem:[%s3628_s30 + $0x48] sm:$0xff] }
 0x6d1   :  { %v1101_v17 = vadd.f32 %v1088_v13, %v875_v43 }
 0x6d2   :  { %v1092_v16 = vpop.f32.mrb[20].mxu1 }
 0x6d3   :  { %v1093_v18 = vadd.f32 %v1092_v16, %v1005_v15  ;;  %v2504_v19 = vpop.f32.mrb[21].mxu1  ;;  %v1110_v24 = vsel %vm805_vm8, %v1101_v17, 0.0  ;;  %v2276_v15 = vld [vmem:[%s3628_s30 + $0x50] sm:$0xff]  ;;  %v2277_v16 = vld [vmem:[%s3628_s30 + $0x58] sm:$0xff] }
 0x6d4   :  { %v2280_v19 = vld [vmem:[%s3628_s30 + $0x70] sm:$0xff] }
 0x6d5   :  { %v1102_v6 = vadd.f32 %v1093_v18, %v876_v54  ;;  %v2279_v18 = vld [vmem:[%s3628_s30 + $0x68] sm:$0xff] }
 0x6d6   :  { %v1097_v23 = vpop.f32.mrb[22].mxu1 }
 0x6d7   :  { %v1111_v25 = vsel %vm805_vm8, %v1102_v6, 0.0  ;;  %v1098_v26 = vadd.f32 %v1097_v23, %v1010_v22  ;;  %v2507_v61 = vpop.f32.mrb[23].mxu1  ;;  %v2282_v22 = vld [vmem:[%s3628_s30 + $0x80] sm:$0xff]  ;;  %v2283_v23 = vld [vmem:[%s3628_s30 + $0x88] sm:$0xff] }
 0x6d8   :  { %v1112_v27 = vadd.f32 %v1111_v25, %v1110_v24  ;;  %v1224_v24 = vpop.permute.xlu0 %1223  ;;  %v1229_v61 = vpop.permute.xlu1 %1228 }
 0x6d9   :  { %v1103_v28 = vadd.f32 %v1098_v26, %v877_v50 }
 0x6db   :  { %v1113_v29 = vsel %vm805_vm8, %v1103_v28, 0.0 }
 0x6dc   :  { %v1114_v30 = vadd.f32 %v1113_v29, %v1112_v27  ;;  %v1219_v25 = vpop.permute.xlu0 %1218 }
 0x6de   :  { %v1115_v32 = vrot.slane %v1114_v30, 4 }
 0x6e0   :  { %v1116_v33 = vadd.f32 %v1115_v32, %v1114_v30  ;;  %v1239_v32 = vpop.permute.xlu1 %1238 }
 0x6e2   :  { %v1117_v34 = vrot.slane %v1116_v33, 2 }
 0x6e4   :  { %v1118_v36 = vadd.f32 %v1117_v34, %v1116_v33 }
 0x6e6   :  { %v1119_v39 = vrot.slane %v1118_v36, 1 }
 0x6e8   :  { %v1120_v47 = vadd.f32 %v1119_v39, %v1118_v36 }
 0x6ea   :  { %v1121_v38 = vmul.f32 0.041666668, %v1120_v47 }
 0x6ec   :  { %v1122_v40 = vsub.f32 %v1101_v17, %v1121_v38  ;;  %v1123_v41 = vsub.f32 %v1102_v6, %v1121_v38  ;;  %v1124_v31 = vsub.f32 %v1103_v28, %v1121_v38  ;;  %v2278_v17 = vld [vmem:[%s3628_s30 + $0x60] sm:$0xff]  ;;  %v2281_v6 = vld [vmem:[%s3628_s30 + $0x78] sm:$0xff]  ;;  %v1234_v28 = vpop.permute.xlu0 %1233 }
 0x6ee   :  { %v1125_v42 = vmul.f32 %v1122_v40, %v1122_v40  ;;  %v1126_v43 = vmul.f32 %v1123_v41, %v1123_v41  ;;  %v1127_v54 = vmul.f32 %v1124_v31, %v1124_v31 }
 0x6f0   :  { %v1128_v2 = vsel %vm805_vm8, %v1125_v42, 0.0  ;;  %v1129_v45 = vsel %vm805_vm8, %v1126_v43, 0.0  ;;  %v1131_v48 = vsel %vm805_vm8, %v1127_v54, 0.0  ;;  %v1209_v33 = vpop.permute.xlu0 %1208 }
 0x6f1   :  { %v1130_v46 = vadd.f32 %v1129_v45, %v1128_v2 }
 0x6f3   :  { %v1132_v50 = vadd.f32 %v1131_v48, %v1130_v46 }
 0x6f5   :  { %v1133_v51 = vrot.slane %v1132_v50, 4 }
 0x6f7   :  { %v1134_v52 = vadd.f32 %v1133_v51, %v1132_v50 }
 0x6f9   :  { %v1135_v53 = vrot.slane %v1134_v52, 2 }
 0x6fb   :  { %v1136_v55 = vadd.f32 %v1135_v53, %v1134_v52 }
 0x6fd   :  { %v1137_v56 = vrot.slane %v1136_v55, 1 }
 0x6ff   :  { %v1138_v57 = vadd.f32 %v1137_v56, %v1136_v55 }
 0x701   :  { %v1139_v58 = vmul.f32 0.041666668, %v1138_v57 }
 0x703   :  { %v1140_v59 = vadd.f32 1e-05, %v1139_v58 }
 0x705   :  { %2665 = vrsqrt.f32 %v1140_v59 }
 0x70f   :  { %v2666_v37 = vpop.eup %2665 }
 0x710   :  { %v1144_v60 = vmul.f32 %v2666_v37, %v1124_v31  ;;  %v1142_v44 = vmul.f32 %v2666_v37, %v1122_v40  ;;  %v1143_v5 = vmul.f32 %v2666_v37, %v1123_v41  ;;  %v1244_v40 = vpop.permute.xlu1 %1243  ;;  %v1204_v41 = vpop.permute.xlu0 %1203 }
 0x712   :  { %v1160_v49 = vmul.f32 %v1148_v62, %v1142_v44  ;;  %v1161_v8 = vmul.f32 %v1153_v63, %v1143_v5  ;;  %v1162_v12 = vmul.f32 %v1158_v11, %v1144_v60 }
 0x714   :  { %v3261_v9 = vadd.f32 %v1166_v3, %v1160_v49  ;;  %v3263_v10 = vadd.f32 %v1171_v0, %v1161_v8  ;;  %v3268_v13 = vadd.f32 %v1176_v35, %v1162_v12  ;;  %v1214_v48 = vpop.permute.xlu1 %1213 }
 0x716   :  { %v2614_v1 = vpack.c.bf16 %v3263_v10, %v3261_v9 }
 0x718   :  { %2615 = vmatpush3.bf16.msra.mxu0 %v2614_v1 }
 0x719   :  { %2512 = vmatprep.subr.mxu0 %v2715_v7 }
 0x71c   :  { %2513 = vmatpush3.msra.mxu0 %v3268_v13 }
 0x71d   :  { %2515 = vmatmul.mubr.msk.f32.vlgmr.msra.gmra.mrb[18].mxu0 %vm304_vm3, %v2275_v14  ;;  %2625 = vmatprep.subr.bf16.mxu0 %v2713_v4 }
 0x71e   :  { %2517 = vmatprep.mubr.msk.f32.mxu0 %vm2714_vm0, %v2715_v7 }
 0x721   :  { %2518 = vmatmul.mubr.msk.f32.gmra.mrb[20].mxu0 %vm304_vm3, %v2276_v15 }
 0x722   :  { %2520 = vmatprep.mubr.msk.f32.mxu0 %vm2714_vm0, %v2715_v7 }
 0x725   :  { %2521 = vmatmul.mubr.msk.f32.gmra.mrb[22].mxu0 %vm304_vm3, %v2277_v16 }
 0x726   :  { %2523 = vmatprep.mubr.msk.f32.mxu0 %vm2714_vm0, %v2715_v7 }
 0x729   :  { %2524 = vmatmul.mubr.msk.f32.gmra.mrb[24].mxu0 %vm304_vm3, %v2278_v17 }
 0x72a   :  { %2526 = vmatprep.mubr.msk.f32.mxu0 %vm2714_vm0, %v2715_v7 }
 0x72d   :  { %2527 = vmatmul.mubr.msk.f32.gmra.mrb[26].mxu0 %vm304_vm3, %v2279_v18 }
 0x72e   :  { %2529 = vmatprep.mubr.msk.f32.mxu0 %vm2714_vm0, %v2715_v7 }
 0x731   :  { %2530 = vmatmul.mubr.msk.f32.gmra.mrb[28].mxu0 %vm304_vm3, %v2280_v19 }
 0x732   :  { %2532 = vmatprep.mubr.msk.f32.mxu0 %vm2714_vm0, %v2715_v7 }
 0x735   :  { %2533 = vmatmul.mubr.msk.f32.gmra.mrb[30].mxu0 %vm304_vm3, %v2281_v6 }
 0x736   :  { %2535 = vmatprep.mubr.msk.f32.mxu0 %vm2714_vm0, %v2715_v7 }
 0x739   :  { %2536 = vmatmul.mubr.msk.f32.gmra.mrb[32].mxu0 %vm304_vm3, %v2282_v22 }
 0x73a   :  { %2538 = vmatprep.mubr.msk.f32.mxu0 %vm2714_vm0, %v2715_v7 }
 0x73d   :  { %2539 = vmatmul.mubr.msk.f32.gmra.mrb[34].mxu0 %vm304_vm3, %v2283_v23 }
 0x73e   :  { %2592 = vmatprep.mubr.msk.f32.mxu0 %vm2714_vm0, %v2715_v7 }
 0x7f0   :  { %v1339_v26 = vpop.f32.mrb[18].mxu0 }
 0x7f1   :  { %v2516_v27 = vpop.f32.mrb[19].mxu0  ;;  %v3328_v31 = vadd.f32 %v1339_v26, %v1204_v41 }
 0x7f4   :  { %v1344_v29 = vpop.f32.mrb[20].mxu0 }
 0x7f5   :  { %v2519_v30 = vpop.f32.mrb[21].mxu0  ;;  %v3330_v43 = vadd.f32 %v1344_v29, %v1209_v33 }
 0x7f8   :  { %v1349_v34 = vpop.f32.mrb[22].mxu0 }
 0x7f9   :  { %v2522_v36 = vpop.f32.mrb[23].mxu0  ;;  %v3340_v51 = vadd.f32 %v1349_v34, %v1214_v48 }
 0x7fc   :  { %v1354_v39 = vpop.f32.mrb[24].mxu0 }
 0x7fd   :  { %v3326_v47 = vadd.f32 %v1354_v39, %v1219_v25  ;;  %v2525_v38 = vpop.f32.mrb[25].mxu0 }
 0x7ff   :  { %v1383_v54 = vmul.f32 %v3326_v47, %v3328_v31 }
 0x800   :  { %v1359_v42 = vpop.f32.mrb[26].mxu0 }
 0x801   :  { %v3334_v2 = vadd.f32 %v1359_v42, %v1224_v24  ;;  %v2528_v45 = vpop.f32.mrb[27].mxu0  ;;  %v1523_v52 = vsel %vm574_vm4, %v1383_v54, 0.0  ;;  %v1385_v15 = vsel %vm237_vm2, %v1383_v54, 0.0 }
 0x803   :  { %v1384_v46 = vmul.f32 %v3334_v2, %v3330_v43  ;;  %1399 = vrot.lane.b32.xlu1 %v3334_v2, %s2718_s22 }
 0x804   :  { %v1364_v50 = vpop.f32.mrb[28].mxu0 }
 0x805   :  { %v1524_v53 = vsel %vm576_vm5, %v1384_v46, 0.0  ;;  %v3344_v55 = vadd.f32 %v1364_v50, %v1229_v61  ;;  %v2531_v56 = vpop.f32.mrb[29].mxu0  ;;  %v1445_v62 = vrot.slane %v1384_v46, 4  ;;  %v1386_v14 = vsel %vm445_vm7, %v1384_v46, 0.0 }
 0x806   :  { %v3346_v57 = vadd.f32 %v1524_v53, %v1523_v52  ;;  %v1387_v16 = vadd.f32 %v1386_v14, %v1385_v15 }
 0x807   :  { %v1442_v58 = vmul.f32 %v3344_v55, %v3340_v51  ;;  %1397 = vrot.lane.b32.xlu1 %v3326_v47, %s2718_s22  ;;  %1461 = vrot.lane.b32.xlu0 %v3344_v55, %s2718_s22 }
 0x808   :  { %v1369_v59 = vpop.f32.mrb[30].mxu0  ;;  %v1388_v6 = vrot.slane %v1387_v16, 4 }
 0x809   :  { %v1446_v63 = vrot.slane %v1442_v58, 4  ;;  %v3354_v37 = vadd.f32 %v1369_v59, %v1234_v28  ;;  %v2534_v3 = vpop.f32.mrb[31].mxu0 }
 0x80a   :  { %v1389_v24 = vadd.f32 %v1388_v6, %v1387_v16 }
 0x80b   :  { %v1447_v60 = vsel %vm505_vm6, %v1445_v62, %v1446_v63  ;;  %v1572_v44 = vsel %vm576_vm5, %v1446_v63, 0.0  ;;  %1422 = vrot.lane.b32.xlu1 %v3354_v37, %s2718_s22  ;;  %v1451_v18 = vsel %vm445_vm7, %v1446_v63, 0.0 }
 0x80c   :  { %v1571_v5 = vsel %vm574_vm4, %v1447_v60, 0.0  ;;  %v1374_v49 = vpop.f32.mrb[32].mxu0  ;;  %v1450_v17 = vsel %vm237_vm2, %v1447_v60, 0.0  ;;  %v1390_v30 = vrot.slane %v1389_v24, 2 }
 0x80d   :  { %v3361_v8 = vadd.f32 %v1572_v44, %v1571_v5  ;;  %v3363_v0 = vadd.f32 %v1374_v49, %v1239_v32  ;;  %v2537_v11 = vpop.f32.mrb[33].mxu0  ;;  %v1452_v19 = vadd.f32 %v1451_v18, %v1450_v17 }
 0x80e   :  { %v1391_v42 = vadd.f32 %v1390_v30, %v1389_v24 }
 0x80f   :  { %1424 = vrot.lane.b32.xlu0 %v3363_v0, %s2718_s22  ;;  %v1453_v23 = vrot.slane %v1452_v19, 4 }
 0x810   :  { %v1379_v12 = vpop.f32.mrb[34].mxu0  ;;  %v1392_v53 = vrot.slane %v1391_v42, 1 }
 0x811   :  { %v3367_v1 = vadd.f32 %v1379_v12, %v1244_v40  ;;  %v2540_v35 = vpop.f32.mrb[35].mxu0  ;;  %v1454_v27 = vadd.f32 %v1453_v23, %v1452_v19 }
 0x812   :  { %v1393_v3 = vadd.f32 %v1392_v53, %v1391_v42 }
 0x813   :  { %1488 = vrot.lane.b32.xlu0 %v3367_v1, %s2718_s22  ;;  %v1455_v38 = vrot.slane %v1454_v27, 2 }
 0x814   :  { %v1394_v12 = vmul.f32 0.28867513, %v1393_v3 }
 0x815   :  { %v1456_v50 = vadd.f32 %v1455_v38, %v1454_v27 }
 0x817   :  { %v1457_v62 = vrot.slane %v1456_v50, 1 }
 0x819   :  { %v1458_v49 = vadd.f32 %v1457_v62, %v1456_v50  ;;  %v1526_v50 = vrot.slane %v3346_v57, 4 }
 0x81b   :  { %v1459_v16 = vmul.f32 0.28867513, %v1458_v49  ;;  %v1527_v3 = vadd.f32 %v1526_v50, %v3346_v57 }
 0x875   :  { %v1400_v22 = vpop.permute.xlu1 %1399 }
 0x876   :  { %v1404_v25 = vmul.f32 %v1400_v22, %v3330_v43 }
 0x878   :  { %v1406_v32 = vsel %vm445_vm7, %v1404_v25, 0.0  ;;  %v1467_v33 = vrot.slane %v1404_v25, 4 }
 0x879   :  { %v1398_v26 = vpop.permute.xlu1 %1397  ;;  %v1462_v61 = vpop.permute.xlu0 %1461 }
 0x87a   :  { %v1403_v28 = vmul.f32 %v1398_v26, %v3328_v31  ;;  %v1464_v29 = vmul.f32 %v1462_v61, %v3340_v51 }
 0x87c   :  { %v1405_v34 = vsel %vm237_vm2, %v1403_v28, 0.0  ;;  %v1468_v36 = vrot.slane %v1464_v29, 4 }
 0x87d   :  { %v1407_v39 = vadd.f32 %v1406_v32, %v1405_v34  ;;  %v1423_v28 = vpop.permute.xlu1 %1422 }
 0x87e   :  { %v1469_v40 = vsel %vm505_vm6, %v1467_v33, %v1468_v36  ;;  %v1473_v41 = vsel %vm445_vm7, %v1468_v36, 0.0  ;;  %v1428_v32 = vsub.f32 %v3354_v37, %v1423_v28 }
 0x87f   :  { %v1408_v54 = vrot.slane %v1407_v39, 4  ;;  %v1472_v45 = vsel %vm237_vm2, %v1469_v40, 0.0 }
 0x880   :  { %v1474_v46 = vadd.f32 %v1473_v41, %v1472_v45 }
 0x881   :  { %v1409_v48 = vadd.f32 %v1408_v54, %v1407_v39  ;;  %v1425_v26 = vpop.permute.xlu0 %1424 }
 0x882   :  { %v1475_v52 = vrot.slane %v1474_v46, 4  ;;  %v1429_v61 = vsub.f32 %v3363_v0, %v1425_v26 }
 0x883   :  { %v1410_v56 = vrot.slane %v1409_v48, 2 }
 0x884   :  { %v1476_v58 = vadd.f32 %v1475_v52, %v1474_v46  ;;  %v1587_v41 = vrot.slane %v1429_v61, 4 }
 0x885   :  { %v1411_v59 = vadd.f32 %v1410_v56, %v1409_v48  ;;  %v1489_v36 = vpop.permute.xlu0 %1488 }
 0x886   :  { %v1477_v63 = vrot.slane %v1476_v58, 2  ;;  %v1491_v39 = vsub.f32 %v3367_v1, %v1489_v36  ;;  %v2314_v36 = vld [vmem:[%s3600_s10 + $0x18] sm:$0xff] }
 0x887   :  { %v1412_v60 = vrot.slane %v1411_v59, 1 }
 0x888   :  { %v1478_v44 = vadd.f32 %v1477_v63, %v1476_v58  ;;  %v1588_v40 = vrot.slane %v1491_v39, 4 }
 0x889   :  { %v1413_v5 = vadd.f32 %v1412_v60, %v1411_v59 }
 0x88a   :  { %v1479_v11 = vrot.slane %v1478_v44, 1  ;;  %v1589_v42 = vsel %vm505_vm6, %v1587_v41, %v1588_v40 }
 0x88b   :  { %v1414_v35 = vmul.f32 0.28867513, %v1413_v5 }
 0x88c   :  { %v1480_v14 = vadd.f32 %v1479_v11, %v1478_v44  ;;  %v2305_v44 = vld [vmem:[%s3598_s8 + $0x18] sm:$0xff] }
 0x88d   :  { %v1415_v15 = vsub.f32 %v1414_v35, %v1394_v12 }
 0x88e   :  { %v1481_v17 = vmul.f32 0.28867513, %v1480_v14  ;;  %v1528_v14 = vrot.slane %v1527_v3, 2 }
 0x88f   :  { %v1416_v18 = vmul.f32 1.442695, %v1415_v15  ;;  %v2307_v15 = vld [vmem:[%s3598_s8 + $0x28] sm:$0xff] }
 0x890   :  { %v1482_v19 = vsub.f32 %v1481_v17, %v1459_v16 }
 0x891   :  { %2667 = vpow2.f32 %v1416_v18 }
 0x892   :  { %v1483_v6 = vmul.f32 1.442695, %v1482_v19  ;;  %v2306_v19 = vld [vmem:[%s3598_s8 + $0x20] sm:$0xff] }
 0x894   :  { %2669 = vpow2.f32 %v1483_v6 }
 0x89b   :  { %v2668_v22 = vpop.eup %2667 }
 0x89c   :  { %v1418_v23 = vadd.f32 1.0, %v2668_v22 }
 0x89e   :  { %v2670_v24 = vpop.eup %2669  ;;  %2671 = vrcp.f32 %v1418_v23  ;;  %v1529_v23 = vadd.f32 %v1528_v14, %v1527_v3  ;;  %v2322_v3 = vld [vmem:[%s3604_s14 + $0x28] sm:$0xff] }
 0x89f   :  { %v1485_v25 = vadd.f32 1.0, %v2670_v24  ;;  %v2340_v14 = vld [vmem:[%s3602_s12 + $0x28] sm:$0xff] }
 0x8a1   :  { %2673 = vrcp.f32 %v1485_v25  ;;  %v2312_v25 = vld [vmem:[%s3599_s9 + $0x20] sm:$0xff] }
 0x8a8   :  { %v2672_v27 = vpop.eup %2671 }
 0x8a9   :  { %v1431_v29 = vmul.f32 %v2672_v27, %v1429_v61  ;;  %v1430_v34 = vmul.f32 %v2672_v27, %v1428_v32 }
 0x8ab   :  { %v2674_v30 = vpop.eup %2673  ;;  %1436 = vrot.lane.b32.xlu1 %v1431_v29, %s2717_s27 }
 0x8ac   :  { %v1492_v33 = vmul.f32 %v2674_v30, %v1429_v61  ;;  %v1493_v38 = vmul.f32 %v2674_v30, %v1491_v39  ;;  %v1530_v30 = vrot.slane %v1529_v23, 1 }
 0x8ae   :  { %1496 = vrot.lane.b32.xlu0 %v1492_v33, %s2717_s27  ;;  %v2315_v33 = vld [vmem:[%s3600_s10 + $0x20] sm:$0xff]  ;;  %v1531_v41 = vadd.f32 %v1530_v30, %v1529_v23 }
 0x8af   :  { %1434 = vrot.lane.b32.xlu1 %v1430_v34, %s2717_s27 }
 0x8b2   :  { %1507 = vrot.lane.b32.xlu0 %v3334_v2, %s2717_s27 }
 0x8b3   :  { %1550 = vrot.lane.b32.xlu1 %v3344_v55, %s2717_s27 }
 0x8b6   :  { %1498 = vrot.lane.b32.xlu0 %v1493_v38, %s2717_s27 }
 0x8b7   :  { %1505 = vrot.lane.b32.xlu1 %v3326_v47, %s2717_s27  ;;  %v1574_v47 = vrot.slane %v3361_v8, 4 }
 0x8b9   :  { %v1575_v62 = vadd.f32 %v1574_v47, %v3361_v8 }
 0x8ba   :  { %1590 = vrot.lane.b32.xlu0 %v1589_v42, %s2717_s27 }
 0x8bb   :  { %1542 = vrot.lane.b32.xlu1 %v1429_v61, %s2717_s27  ;;  %v2311_v61 = vld [vmem:[%s3599_s9 + $0x18] sm:$0xff] }
 0x8be   :  { %1540 = vrot.lane.b32.xlu0 %v1428_v32, %s2717_s27 }
 0x8bf   :  { %1592 = vrot.lane.b32.xlu1 %v1588_v40, %s2717_s27 }
 0x91d   :  { %v1437_v2 = vpop.permute.xlu1 %1436 }
 0x91e   :  { %v1441_v54 = vadd.f32 %v1437_v2, %v3363_v0  ;;  %v2316_v2 = vld [vmem:[%s3600_s10 + $0x28] sm:$0xff] }
 0x920   :  { %v1497_v55 = vpop.permute.xlu0 %1496 }
 0x921   :  { %v1502_v45 = vadd.f32 %v1497_v55, %v3363_v0  ;;  %v1435_v46 = vpop.permute.xlu1 %1434 }
 0x922   :  { %v1440_v48 = vadd.f32 %v1435_v46, %v3354_v37 }
 0x923   :  { %v1504_v52 = vsel %vm505_vm6, %v1441_v54, %v1502_v45  ;;  %v2313_v54 = vld [vmem:[%s3599_s9 + $0x28] sm:$0xff] }
 0x924   :  { %v2642_v53 = vpack.i.bf16 %v1504_v52, %v1440_v48  ;;  %v1508_v56 = vpop.permute.xlu0 %1507  ;;  %v1532_v48 = vmul.f32 0.28867513, %v1531_v41  ;;  %v2321_v52 = vld [vmem:[%s3604_s14 + $0x20] sm:$0xff] }
 0x925   :  { %v1512_v58 = vmul.f32 %v1508_v56, %v3330_v43  ;;  %v1551_v59 = vpop.permute.xlu1 %1550  ;;  %v1576_v43 = vrot.slane %v1575_v62, 2  ;;  %v2320_v56 = vld [vmem:[%s3604_s14 + $0x18] sm:$0xff] }
 0x926   :  { %v1553_v63 = vmul.f32 %v1551_v59, %v3340_v51  ;;  %2643 = vrot.lane.b32.xlu0 %v2642_v53, %s2718_s22 }
 0x927   :  { %v1556_v60 = vrot.slane %v1512_v58, 4  ;;  %v1514_v16 = vsel %vm576_vm5, %v1512_v58, 0.0  ;;  %v1577_v6 = vadd.f32 %v1576_v43, %v1575_v62 }
 0x928   :  { %v1557_v5 = vrot.slane %v1553_v63, 4  ;;  %v1499_v49 = vpop.permute.xlu0 %1498  ;;  %v2329_v63 = vld [vmem:[%s3606_s16 + $0x18] sm:$0xff] }
 0x929   :  { %v1503_v11 = vadd.f32 %v1499_v49, %v3367_v1  ;;  %v1506_v12 = vpop.permute.xlu1 %1505  ;;  %v1578_v28 = vrot.slane %v1577_v6, 1  ;;  %v2335_v49 = vld [vmem:[%s3601_s11 + $0x18] sm:$0xff] }
 0x92a   :  { %v1558_v35 = vsel %vm505_vm6, %v1556_v60, %v1557_v5  ;;  %v1562_v8 = vsel %vm576_vm5, %v1557_v5, 0.0  ;;  %v1511_v51 = vmul.f32 %v1506_v12, %v3328_v31  ;;  %1633 = vperm.xlu0 %2635, %v2305_v44   ;;  %v2331_v60 = vld [vmem:[%s3606_s16 + $0x28] sm:$0xff]  ;;  %v2330_v44 = vld [vmem:[%s3606_s16 + $0x20] sm:$0xff] }
 0x92b   :  { %v1561_v57 = vsel %vm574_vm4, %v1558_v35, 0.0  ;;  %1615 = vrot.lane.b32.xlu1 %v1503_v11, %s2718_s22  ;;  %v1579_v38 = vadd.f32 %v1578_v28, %v1577_v6  ;;  %v2336_v5 = vld [vmem:[%s3601_s11 + $0x20] sm:$0xff] }
 0x92c   :  { %v1563_v17 = vadd.f32 %v1562_v8, %v1561_v57  ;;  %v1513_v18 = vsel %vm574_vm4, %v1511_v51, 0.0  ;;  %v2339_v35 = vld [vmem:[%s3602_s12 + $0x20] sm:$0xff]  ;;  %v2338_v51 = vld [vmem:[%s3602_s12 + $0x18] sm:$0xff]  ;;  %v2337_v57 = vld [vmem:[%s3601_s11 + $0x28] sm:$0xff] }
 0x92d   :  { %v1515_v31 = vadd.f32 %v1514_v16, %v1513_v18  ;;  %v1580_v46 = vmul.f32 0.28867513, %v1579_v38  ;;  %v2127_v16 = vld [vmem:[%s3608_s18] sm:$0x3f]  ;;  %v1591_v18 = vpop.permute.xlu0 %1590  ;;  %v1543_v6 = vpop.permute.xlu1 %1542 }
 0x92e   :  { %v1564_v22 = vrot.slane %v1563_v17, 4  ;;  %1643 = vperm.xlu0 %2635, %v2307_v15   ;;  %v2207_v15 = vld [vmem:[%s3609_s19] sm:$0x3f] }
 0x92f   :  { %v1516_v24 = vrot.slane %v1515_v31, 4  ;;  %1638 = vperm.xlu1 %2636, %v2306_v19  }
 0x930   :  { %v1565_v26 = vadd.f32 %v1564_v22, %v1563_v17  ;;  %v2222_v22 = vld [vmem:[#allocation2] sm:$0x1] }
 0x931   :  { %v1517_v27 = vadd.f32 %v1516_v24, %v1515_v31  ;;  %v1541_v28 = vpop.permute.xlu0 %1540 }
 0x932   :  { %v1566_v29 = vrot.slane %v1565_v26, 2  ;;  %1788 = vperm.xlu0 %2635, %v2312_v25  }
 0x933   :  { %v1518_v32 = vrot.slane %v1517_v27, 2  ;;  %1783 = vperm.xlu1 %2636, %v2311_v61  }
 0x934   :  { %v1567_v34 = vadd.f32 %v1566_v29, %v1565_v26 }
 0x935   :  { %v1519_v39 = vadd.f32 %v1518_v32, %v1517_v27  ;;  %v1593_v27 = vpop.permute.xlu1 %1592 }
 0x936   :  { %v1568_v40 = vrot.slane %v1567_v34, 1  ;;  %1806 = vperm.xlu0 %2635, %v2315_v33  }
 0x937   :  { %v1520_v42 = vrot.slane %v1519_v39, 1  ;;  %1801 = vperm.xlu1 %2636, %v2314_v36  }
 0x938   :  { %v1569_v55 = vadd.f32 %v1568_v40, %v1567_v34 }
 0x939   :  { %v1521_v45 = vadd.f32 %v1520_v42, %v1519_v39 }
 0x93a   :  { %v1570_v47 = vmul.f32 0.28867513, %v1569_v55  ;;  %1811 = vperm.xlu0 %2635, %v2316_v2   ;;  %v2302_v55 = vld [vmem:[%s3597_s7 + $0x18] sm:$0xff] }
 0x93b   :  { %v1522_v50 = vmul.f32 0.28867513, %v1521_v45  ;;  %1793 = vperm.xlu1 %2636, %v2313_v54   ;;  %v2304_v54 = vld [vmem:[%s3597_s7 + $0x28] sm:$0xff] }
 0x93c   :  { %v1581_v53 = vsub.f32 %v1580_v46, %v1570_v47 }
 0x93d   :  { %v1533_v58 = vsub.f32 %v1532_v48, %v1522_v50 }
 0x93e   :  { %v1582_v59 = vmul.f32 1.442695, %v1581_v53  ;;  %1832 = vperm.xlu0 %2635, %v2321_v52  }
 0x93f   :  { %v1534_v62 = vmul.f32 1.442695, %v1533_v58  ;;  %1827 = vperm.xlu1 %2636, %v2320_v56  }
 0x940   :  { %2675 = vpow2.f32 %v1582_v59 }
 0x941   :  { %2677 = vpow2.f32 %v1534_v62 }
 0x942   :  { %1942 = vperm.xlu0 %2635, %v2329_v63  }
 0x943   :  { %1837 = vperm.xlu1 %2636, %v2322_v3  }
 0x946   :  { %1952 = vperm.xlu0 %2635, %v2331_v60  }
 0x947   :  { %1947 = vperm.xlu1 %2636, %v2330_v44  }
 0x94a   :  { %v2676_v11 = vpop.eup %2675  ;;  %2097 = vperm.xlu0 %2635, %v2336_v5  }
 0x94b   :  { %v2678_v12 = vpop.eup %2677  ;;  %v1584_v43 = vadd.f32 1.0, %v2676_v11  ;;  %2092 = vperm.xlu1 %2636, %v2335_v49  }
 0x94c   :  { %v1536_v8 = vadd.f32 1.0, %v2678_v12 }
 0x94d   :  { %2679 = vrcp.f32 %v1584_v43 }
 0x94e   :  { %2681 = vrcp.f32 %v1536_v8  ;;  %2115 = vperm.xlu0 %2635, %v2339_v35  }
 0x94f   :  { %2110 = vperm.xlu1 %2636, %v2338_v51  }
 0x952   :  { %2120 = vperm.xlu0 %2635, %v2340_v14  }
 0x953   :  { %2102 = vperm.xlu1 %2636, %v2337_v57  }
 0x956   :  { %2210 = vperm.xlu0 %2635, %v2207_v15  }
 0x957   :  { %v2680_v17 = vpop.eup %2679  ;;  %2130 = vperm.xlu1 %2636, %v2127_v16  }
 0x958   :  { %v2682_v19 = vpop.eup %2681  ;;  %v1596_v31 = vmul.f32 %v2680_v17, %v1591_v18  ;;  %v1597_v29 = vmul.f32 %v2680_v17, %v1593_v27 }
 0x959   :  { %v1547_v23 = vmul.f32 %v2682_v19, %v1543_v6  ;;  %v1546_v30 = vmul.f32 %v2682_v19, %v1541_v28 }
 0x95a   :  { %v1600_v24 = vrot.slane %v1596_v31, 4  ;;  %v1601_v32 = vrot.slane %v1597_v29, 4 }
 0x95b   :  { %v1549_v25 = vadd.f32 %v1547_v23, %v3363_v0  ;;  %2225 = vperm.xlu1 %2636, %v2222_v22   ;;  %v1548_v34 = vadd.f32 %v1546_v30, %v3354_v37 }
 0x95c   :  { %v1605_v26 = vadd.f32 %v1600_v24, %v3363_v0  ;;  %v1602_v41 = vsel %vm505_vm6, %v1600_v24, %v1601_v32 }
 0x95d   :  { %v1606_v2 = vadd.f32 %v1602_v41, %v3367_v1  ;;  %v2303_v1 = vld [vmem:[%s3597_s7 + $0x20] sm:$0xff] }
 0x95e   :  { %v1607_v61 = vsel %vm505_vm6, %v1549_v25, %v1605_v26 }
 0x998   :  { %v2644_v33 = vpop.permute.xlu0 %2643 }
 0x999   :  { %v2646_v36 = vunpack.i.h.bf16 %v2644_v33  ;;  %v2645_v39 = vunpack.i.l.bf16 %v2644_v33 }
 0x99b   :  { %v1621_v38 = vsel %vm237_vm2, %v2646_v36, %v1607_v61  ;;  %v1620_v40 = vsel %vm237_vm2, %v2645_v39, %v1548_v34 }
 0x99c   :  { %v2617_v42 = vpack.c.bf16 %v1621_v38, %v1620_v40 }
 0x99d   :  { %v1616_v0 = vpop.permute.xlu1 %1615 }
 0x99e   :  { %2618 = vmatpush3.bf16.msra.mxu1 %v2617_v42  ;;  %v1622_v37 = vsel %vm237_vm2, %v1616_v0, %v1606_v2 }
 0x99f   :  { %2545 = vmatprep.subr.mxu1 %v2715_v7 }
 0x9a2   :  { %2546 = vmatpush3.msra.mxu1 %v1622_v37 }
 0x9a3   :  { %2548 = vmatmul.mubr.msk.f32.vlgmr.msra.gmra.mrb[24].mxu1 %vm304_vm3, %v2302_v55  ;;  %2619 = vmatprep.subr.bf16.mxu1 %v2713_v4 }
 0x9a4   :  { %2550 = vmatprep.mubr.msk.f32.mxu1 %vm2714_vm0, %v2715_v7 }
 0x9a7   :  { %2551 = vmatmul.mubr.msk.f32.gmra.mrb[26].mxu1 %vm304_vm3, %v2303_v1 }
 0x9a8   :  { %2553 = vmatprep.mubr.msk.f32.mxu1 %vm2714_vm0, %v2715_v7 }
 0x9a9   :  { %v1634_v45 = vpop.permute.xlu0 %1633 }
 0x9ab   :  { %2554 = vmatmul.mubr.msk.f32.gmra.mrb[28].mxu1 %vm304_vm3, %v2304_v54 }
 0x9ac   :  { %2562 = vmatprep.mubr.msk.f32.mxu1 %vm2714_vm0, %v2715_v7 }
 0x9ad   :  { %v1644_v62 = vpop.permute.xlu0 %1643 }
 0x9ae   :  { %v1639_v50 = vpop.permute.xlu1 %1638 }
 0x9b1   :  { %v1789_v34 = vpop.permute.xlu0 %1788 }
 0x9b2   :  { %v1784_v33 = vpop.permute.xlu1 %1783 }
 0x9b5   :  { %v1807_v2 = vpop.permute.xlu0 %1806 }
 0x9b6   :  { %v1802_v39 = vpop.permute.xlu1 %1801 }
 0x9ba   :  { %v1794_v1 = vpop.permute.xlu1 %1793 }
 0xa76   :  { %v1721_v46 = vpop.f32.mrb[24].mxu1 }
 0xa77   :  { %v1722_v47 = vadd.f32 %v1721_v46, %v1634_v45  ;;  %v2549_v48 = vpop.f32.mrb[25].mxu1  ;;  %v1812_v46 = vpop.permute.xlu0 %1811 }
 0xa78   :  { %v2317_v48 = vld [vmem:[%s3603_s13 + $0x18] sm:$0xff] }
 0xa79   :  { %v1735_v53 = vadd.f32 %v1722_v47, %v3261_v9 }
 0xa7a   :  { %v1726_v52 = vpop.f32.mrb[26].mxu1 }
 0xa7b   :  { %v1727_v56 = vadd.f32 %v1726_v52, %v1639_v50  ;;  %v2552_v58 = vpop.f32.mrb[27].mxu1  ;;  %v1746_v3 = vsel %vm805_vm8, %v1735_v53, 0.0  ;;  %v2318_v50 = vld [vmem:[%s3603_s13 + $0x20] sm:$0xff]  ;;  %v2319_v52 = vld [vmem:[%s3603_s13 + $0x28] sm:$0xff] }
 0xa7d   :  { %v1736_v59 = vadd.f32 %v1727_v56, %v3263_v10  ;;  %v1828_v56 = vpop.permute.xlu1 %1827 }
 0xa7e   :  { %v1731_v63 = vpop.f32.mrb[28].mxu1 }
 0xa7f   :  { %v1747_v60 = vsel %vm805_vm8, %v1736_v59, 0.0  ;;  %v1732_v44 = vadd.f32 %v1731_v63, %v1644_v62  ;;  %v2555_v5 = vpop.f32.mrb[29].mxu1 }
 0xa80   :  { %v1748_v49 = vadd.f32 %v1747_v60, %v1746_v3 }
 0xa81   :  { %v1737_v11 = vadd.f32 %v1732_v44, %v3268_v13  ;;  %v1838_v5 = vpop.permute.xlu1 %1837 }
 0xa83   :  { %v1749_v12 = vsel %vm805_vm8, %v1737_v11, 0.0 }
 0xa84   :  { %v1750_v43 = vadd.f32 %v1749_v12, %v1748_v49 }
 0xa86   :  { %v1751_v35 = vrot.slane %v1750_v43, 4 }
 0xa88   :  { %v1752_v9 = vadd.f32 %v1751_v35, %v1750_v43 }
 0xa8a   :  { %v1753_v8 = vrot.slane %v1752_v9, 2 }
 0xa8c   :  { %v1754_v51 = vadd.f32 %v1753_v8, %v1752_v9  ;;  %v2326_v9 = vld [vmem:[%s3605_s15 + $0x18] sm:$0xff]  ;;  %v2327_v8 = vld [vmem:[%s3605_s15 + $0x20] sm:$0xff] }
 0xa8e   :  { %v1755_v14 = vrot.slane %v1754_v51, 1 }
 0xa90   :  { %v1756_v10 = vadd.f32 %v1755_v14, %v1754_v51  ;;  %v2328_v51 = vld [vmem:[%s3605_s15 + $0x28] sm:$0xff] }
 0xa92   :  { %v1757_v57 = vmul.f32 0.041666668, %v1756_v10 }
 0xa94   :  { %v1758_v15 = vsub.f32 %v1735_v53, %v1757_v57  ;;  %v1759_v16 = vsub.f32 %v1736_v59, %v1757_v57  ;;  %v1760_v17 = vsub.f32 %v1737_v11, %v1757_v57  ;;  %v1833_v59 = vpop.permute.xlu0 %1832 }
 0xa96   :  { %v1761_v18 = vmul.f32 %v1758_v15, %v1758_v15  ;;  %v1762_v19 = vmul.f32 %v1759_v16, %v1759_v16  ;;  %v1763_v31 = vmul.f32 %v1760_v17, %v1760_v17 }
 0xa98   :  { %v1764_v6 = vsel %vm805_vm8, %v1761_v18, 0.0  ;;  %v1765_v13 = vsel %vm805_vm8, %v1762_v19, 0.0  ;;  %v1767_v23 = vsel %vm805_vm8, %v1763_v31, 0.0  ;;  %v1943_v14 = vpop.permute.xlu0 %1942 }
 0xa99   :  { %v1766_v22 = vadd.f32 %v1765_v13, %v1764_v6 }
 0xa9b   :  { %v1768_v24 = vadd.f32 %v1767_v23, %v1766_v22 }
 0xa9c   :  { %v1953_v13 = vpop.permute.xlu0 %1952 }
 0xa9d   :  { %v1769_v25 = vrot.slane %v1768_v24, 4 }
 0xa9f   :  { %v1770_v26 = vadd.f32 %v1769_v25, %v1768_v24 }
 0xaa1   :  { %v1771_v61 = vrot.slane %v1770_v26, 2 }
 0xaa3   :  { %v1772_v27 = vadd.f32 %v1771_v61, %v1770_v26 }
 0xaa5   :  { %v1773_v28 = vrot.slane %v1772_v27, 1 }
 0xaa7   :  { %v1774_v29 = vadd.f32 %v1773_v28, %v1772_v27 }
 0xaa9   :  { %v1775_v30 = vmul.f32 0.041666668, %v1774_v29 }
 0xaab   :  { %v1776_v32 = vadd.f32 1e-05, %v1775_v30 }
 0xaad   :  { %2683 = vrsqrt.f32 %v1776_v32 }
 0xab7   :  { %v2684_v36 = vpop.eup %2683 }
 0xab8   :  { %v1780_v38 = vmul.f32 %v2684_v36, %v1760_v17  ;;  %v1778_v40 = vmul.f32 %v2684_v36, %v1758_v15  ;;  %v1779_v41 = vmul.f32 %v2684_v36, %v1759_v16  ;;  %v1948_v16 = vpop.permute.xlu1 %1947 }
 0xaba   :  { %v1796_v42 = vmul.f32 %v1784_v33, %v1778_v40  ;;  %v1797_v0 = vmul.f32 %v1789_v34, %v1779_v41  ;;  %v1798_v54 = vmul.f32 %v1794_v1, %v1780_v38 }
 0xabc   :  { %v1814_v55 = vadd.f32 %v1802_v39, %v1796_v42  ;;  %v1815_v37 = vadd.f32 %v1807_v2, %v1797_v0  ;;  %v1816_v47 = vadd.f32 %v1812_v46, %v1798_v54 }
 0xabe   :  { %v2620_v45 = vpack.c.bf16 %v1815_v37, %v1814_v55 }
 0xac0   :  { %2621 = vmatpush3.bf16.msra.mxu1 %v2620_v45 }
 0xac1   :  { %2560 = vmatprep.subr.mxu1 %v2715_v7 }
 0xac4   :  { %2561 = vmatpush3.msra.mxu1 %v1816_v47 }
 0xac5   :  { %2563 = vmatmul.mubr.msk.f32.vlgmr.msra.gmra.mrb[30].mxu1 %vm304_vm3, %v2317_v48  ;;  %2622 = vmatprep.subr.bf16.mxu1 %v2713_v4 }
 0xac6   :  { %2565 = vmatprep.mubr.msk.f32.mxu1 %vm2714_vm0, %v2715_v7 }
 0xac9   :  { %2566 = vmatmul.mubr.msk.f32.gmra.mrb[32].mxu1 %vm304_vm3, %v2318_v50 }
 0xaca   :  { %2568 = vmatprep.mubr.msk.f32.mxu1 %vm2714_vm0, %v2715_v7 }
 0xacd   :  { %2569 = vmatmul.mubr.msk.f32.gmra.mrb[34].mxu1 %vm304_vm3, %v2319_v52 }
 0xace   :  { %2577 = vmatprep.mubr.msk.f32.mxu1 %vm2714_vm0, %v2715_v7 }
 0xb98   :  { %v1915_v4 = vpop.f32.mrb[30].mxu1 }
 0xb99   :  { %v2564_v53 = vpop.f32.mrb[31].mxu1  ;;  %v1916_v58 = vadd.f32 %v1915_v4, %v1828_v56 }
 0xb9b   :  { %v1929_v60 = vmax.f32 %v1916_v58, 0.0 }
 0xb9c   :  { %v1920_v62 = vpop.f32.mrb[32].mxu1 }
 0xb9d   :  { %v1921_v63 = vadd.f32 %v1920_v62, %v1833_v59  ;;  %v2567_v3 = vpop.f32.mrb[33].mxu1  ;;  %v2093_v59 = vpop.permute.xlu1 %2092 }
 0xb9e   :  { %v2098_v62 = vpop.permute.xlu0 %2097 }
 0xb9f   :  { %v1930_v44 = vmax.f32 %v1921_v63, 0.0 }
 0xba0   :  { %v1925_v49 = vpop.f32.mrb[34].mxu1 }
 0xba1   :  { %v2623_v11 = vpack.c.bf16 %v1930_v44, %v1929_v60  ;;  %v1926_v12 = vadd.f32 %v1925_v49, %v1838_v5  ;;  %v2570_v43 = vpop.f32.mrb[35].mxu1  ;;  %v2111_v3 = vpop.permute.xlu1 %2110 }
 0xba3   :  { %2624 = vmatpush3.bf16.msra.mxu1 %v2623_v11  ;;  %v1931_v35 = vmax.f32 %v1926_v12, 0.0  ;;  %v2116_v12 = vpop.permute.xlu0 %2115 }
 0xba4   :  { %2575 = vmatprep.subr.mxu1 %v2715_v7 }
 0xba7   :  { %2576 = vmatpush3.msra.mxu1 %v1931_v35 }
 0xba8   :  { %2578 = vmatmul.mubr.msk.f32.vlgmr.msra.gmra.mrb[36].mxu1 %vm304_vm3, %v2326_v9  ;;  %v2103_v9 = vpop.permute.xlu1 %2102 }
 0xba9   :  { %2580 = vmatprep.mubr.msk.f32.mxu1 %vm2714_vm0, %v2715_v7 }
 0xbac   :  { %2581 = vmatmul.mubr.msk.f32.gmra.mrb[38].mxu1 %vm304_vm3, %v2327_v8 }
 0xbad   :  { %2583 = vmatprep.mubr.msk.f32.mxu1 %vm2714_vm0, %v2715_v7 }
 0xbb0   :  { %2584 = vmatmul.mubr.msk.f32.gmra.mrb[40].mxu1 %vm304_vm3, %v2328_v51 }
 0xc7b   :  { %v2030_v10 = vpop.f32.mrb[36].mxu1 }
 0xc7c   :  { %v2031_v57 = vadd.f32 %v2030_v10, %v1943_v14  ;;  %v2579_v15 = vpop.f32.mrb[37].mxu1  ;;  %v2121_v14 = vpop.permute.xlu0 %2120 }
 0xc7d   :  { %v2131_v15 = vpop.permute.xlu1 %2130 }
 0xc7e   :  { %v2044_v18 = vadd.f32 %v2031_v57, %v1814_v55  ;;  %v2126_v57 = vld [vmem:[%s3607_s17] sm:$0x3f]  ;;  %s2719_s17 = smov [#allocation3]  }
 0xc7f   :  { %v2035_v17 = vpop.f32.mrb[38].mxu1  ;;  %s2246_s27 = sshll.u32 %s2719_s17, 4  ;;  %s2247_s27 = int_to_ptr.vmem [resolvable:$true] %s2246_s27 }
 0xc80   :  { %v2036_v19 = vadd.f32 %v2035_v17, %v1948_v16  ;;  %v2582_v31 = vpop.f32.mrb[39].mxu1  ;;  %v2055_v23 = vsel %vm805_vm8, %v2044_v18, 0.0  ;;  %s2689_s30 = scalar_lea.vmem %s2247_s27, 32  ;;  %p2694_p1 = scmp.lt.s32.totalorder %s2247_s27, %s2247_s27 }
 0xc81   :  { %v2211_v31 = vpop.permute.xlu0 %2210  ;;  %p2690_p0 = scmp.ne.s32.totalorder %s2247_s27, %s2689_s30  ;;  %p2695_p2 = scmp.lt.s32.totalorder %s2689_s30, %s2689_s30 }
 0xc82   :  { %v2045_v6 = vadd.f32 %v2036_v19, %v1815_v37 }
 0xc83   :  { %v2040_v22 = vpop.f32.mrb[40].mxu1  ;;  %p2696_p3 = por %p2695_p2, %p2694_p1 }
 0xc84   :  { %v2056_v24 = vsel %vm805_vm8, %v2045_v6, 0.0  ;;  %v2041_v25 = vadd.f32 %v2040_v22, %v1953_v13  ;;  %v2585_v26 = vpop.f32.mrb[41].mxu1 }
 0xc85   :  { %v2057_v61 = vadd.f32 %v2056_v24, %v2055_v23  ;;  %p2697_p4 = pnand %p2696_p3, %p2690_p0 }
 0xc86   :  { %v2046_v27 = vadd.f32 %v2041_v25, %v1816_v47  ;;  %v2226_v25 = vpop.permute.xlu1 %2225 }
 0xc88   :  { %v2058_v28 = vsel %vm805_vm8, %v2046_v27, 0.0 }
 0xc89   :  { %v2059_v29 = vadd.f32 %v2058_v28, %v2057_v61  ;;  %v2231_v61 = vrot.slane %v2226_v25, %v207_v21 }
 0xc8b   :  { %v2060_v30 = vrot.slane %v2059_v29, 4 }
 0xc8d   :  { %v2061_v32 = vadd.f32 %v2060_v30, %v2059_v29 }
 0xc8f   :  { %v2062_v33 = vrot.slane %v2061_v32, 2 }
 0xc91   :  { %v2063_v34 = vadd.f32 %v2062_v33, %v2061_v32 }
 0xc93   :  { %v2064_v36 = vrot.slane %v2063_v34, 1 }
 0xc95   :  { %v2065_v39 = vadd.f32 %v2064_v36, %v2063_v34 }
 0xc97   :  { %v2066_v38 = vmul.f32 0.041666668, %v2065_v39 }
 0xc99   :  { %v2067_v40 = vsub.f32 %v2044_v18, %v2066_v38  ;;  %v2068_v41 = vsub.f32 %v2045_v6, %v2066_v38  ;;  %v2069_v42 = vsub.f32 %v2046_v27, %v2066_v38 }
 0xc9b   :  { %v2070_v0 = vmul.f32 %v2067_v40, %v2067_v40  ;;  %v2071_v2 = vmul.f32 %v2068_v41, %v2068_v41  ;;  %v2072_v55 = vmul.f32 %v2069_v42, %v2069_v42 }
 0xc9d   :  { %v2073_v37 = vsel %vm805_vm8, %v2070_v0, 0.0  ;;  %v2074_v1 = vsel %vm805_vm8, %v2071_v2, 0.0  ;;  %v2076_v45 = vsel %vm805_vm8, %v2072_v55, 0.0 }
 0xc9e   :  { %v2075_v54 = vadd.f32 %v2074_v1, %v2073_v37 }
 0xca0   :  { %v2077_v46 = vadd.f32 %v2076_v45, %v2075_v54 }
 0xca2   :  { %v2078_v47 = vrot.slane %v2077_v46, 4 }
 0xca4   :  { %v2079_v48 = vadd.f32 %v2078_v47, %v2077_v46 }
 0xca6   :  { %v2080_v50 = vrot.slane %v2079_v48, 2 }
 0xca8   :  { %v2081_v52 = vadd.f32 %v2080_v50, %v2079_v48 }
 0xcaa   :  { %v2082_v4 = vrot.slane %v2081_v52, 1 }
 0xcac   :  { %v2083_v53 = vadd.f32 %v2082_v4, %v2081_v52 }
 0xcae   :  { %v2084_v56 = vmul.f32 0.041666668, %v2083_v53 }
 0xcb0   :  { %v2085_v58 = vadd.f32 1e-05, %v2084_v56 }
 0xcb2   :  { %2685 = vrsqrt.f32 %v2085_v58 }
 0xcbc   :  { %v2686_v63 = vpop.eup %2685 }
 0xcbd   :  { %v2089_v60 = vmul.f32 %v2686_v63, %v2069_v42  ;;  %v2087_v44 = vmul.f32 %v2686_v63, %v2067_v40  ;;  %v2088_v5 = vmul.f32 %v2686_v63, %v2068_v41 }
 0xcbf   :  { %v2105_v49 = vmul.f32 %v2093_v59, %v2087_v44  ;;  %v2106_v11 = vmul.f32 %v2098_v62, %v2088_v5  ;;  %v2107_v8 = vmul.f32 %v2103_v9, %v2089_v60 }
 0xcc1   :  { %v2123_v43 = vadd.f32 %v2111_v3, %v2105_v49  ;;  %v2124_v35 = vadd.f32 %v2116_v12, %v2106_v11  ;;  %v2125_v10 = vadd.f32 %v2121_v14, %v2107_v8 }
 0xcc3   :  { %v2626_v51 = vpack.c.bf16 %v2124_v35, %v2123_v43 }
 0xcc5   :  { %2627 = vmatpush3.bf16.msra.mxu0 %v2626_v51 }
 0xcc6   :  { %2590 = vmatprep.subr.mxu0 %v2715_v7 }
 0xcc9   :  { %2591 = vmatpush3.msra.mxu0 %v2125_v10 }
 0xcca   :  { %2593 = vmatmul.mubr.msk.f32.vlgmr.msra.gmra.mrb[36].mxu0 %vm304_vm3, %v2126_v57 }
 0xd9d   :  { %v2202_v16 = vpop.f32.mrb[36].mxu0 }
 0xd9e   :  { %v2203_v17 = vadd.f32 %v2202_v16, %v2131_v15  ;;  %v2594_v18 = vpop.f32.mrb[37].mxu0 }
 0xda0   :  { %2687 = vtanh.f32 %v2203_v17 }
 0xdaa   :  { %v2688_v19 = vpop.eup %2687 }
 0xdab   :  { %v2213_v6 = vmul.f32 %v2688_v19, %v2211_v31 }
 0xdad   :  { %v2215_v13 = vsel %vm2214_vm9, %v2213_v6, 0.0 }
 0xdae   :  { %v2216_v22 = vrot.slane %v2215_v13, 4 }
 0xdb0   :  { %v2217_v7 = vadd.f32 %v2216_v22, %v2215_v13 }
 0xdb2   :  { %v2218_v23 = vrot.slane %v2217_v7, 2 }
 0xdb4   :  { %v2219_v24 = vadd.f32 %v2218_v23, %v2217_v7 }
 0xdb6   :  { %v2220_v26 = vrot.slane %v2219_v24, 1 }
 0xdb8   :  { %v2221_v27 = vadd.f32 %v2220_v26, %v2219_v24 }
 0xdba   :  { %v2232_v28 = vadd.f32 %v2231_v61, %v2221_v27 }
 0xdbc   :  { %2236 = vrot.lane.b32.xlu0 %v2232_v28, %s2718_s22  ;;  %2234 = vst.msk [vmem:[#allocation3] sm:$0x1] %vm2233_vm10, %v2232_v28 }
 0xe2e   :  { %v2237_v29 = vpop.permute.xlu0 %2236 }
 0xe2f   :  { %2239 = vst.msk [vmem:[#allocation3 + $0x1] sm:$0x1] %vm2233_vm10, %v2237_v29 }
 0xe30   :  { %2700 = shalt.err (!%p2697_p4)
}
 0xe31   :  { %s2701_s25 = scalar_lea.hbm %s3611_s21, 32 }
 0xe32   :  { %p2702_p5 = scmp.ne.s32.totalorder %s3611_s21, %s2701_s25  ;;  %p2705_p6 = scmp.lt.u32.totalorder %s2701_s25, %s3611_s21 }
 0xe34   :  { %p2707_p7 = pnand %p2705_p6, %p2702_p5 }
 0xe36   :  { %2710 = shalt.err (!%p2707_p7)
}
 0xe37   :  { %2249 = dma.vmem_to_hbm [thread:$0]  %s2247_s27, 32, %s3611_s21, [#allocation4]  }
 0xe38   :  { %2711 = dma.done.wait [#allocation4], 32  }
 0xe39   :  { %2712 = vsyncadd [#allocation4], 4294967264 }
 0xe3a   :  { %2253 = vsyncpa [#allocation4], 1 }

</bundles_post_ra>
